<compile_context>
chip_gen: v5e
topology: v5e:2x2
jax: 0.10.0
libtpu: 0.0.40
codegen_flags: <defaults>
</compile_context>

<pallas_src>
import functools
import math

import jax
import jax.numpy as jnp
from jax.experimental import pallas as pl
from jax.experimental.pallas import tpu as pltpu

EPS = 1e-5  # PyTorch LayerNorm default


def _layernorm(x, g, b):
    # x: (R, E) f32, g/b: (1, E) f32
    mu = jnp.mean(x, axis=-1, keepdims=True)
    var = jnp.mean(jnp.square(x - mu), axis=-1, keepdims=True)
    return (x - mu) * jax.lax.rsqrt(var + EPS) * g + b


def encoder_layer_kernel(
    x_ref,                     # (TB, L, E) input block, f32
    g1_ref, bn1_ref,           # norm1 gamma/beta            (1, E)   f32
    win_ref, bin_ref,          # in_proj weight^T / bias     (E, 3E) bf16, (1, 3E) f32  (q-scale folded)
    wout_ref, bout_ref,        # out_proj weight^T / bias    (E, E)  bf16, (1, E)  f32
    w1_ref, bf1_ref,           # linear1 weight^T / bias     (E, 4E) bf16, (1, 4E) f32
    w2_ref, bf2_ref,           # linear2 weight^T / bias     (4E, E) bf16, (1, E)  f32
    g2_ref, bn2_ref,           # norm2 gamma/beta            (1, E)   f32
    o_ref,                     # (TB, L, E) output block, f32
    *, num_heads,
):
    TB, L, E = x_ref.shape
    dh = E // num_heads
    R = TB * L

    x = x_ref[...].reshape(R, E)                           # (R, E) f32

    # ---------------- self-attention block (pre-norm) ----------------
    y16 = _layernorm(x, g1_ref[...], bn1_ref[...]).astype(jnp.bfloat16)
    # 1/sqrt(dh) already folded into the Q columns of win/bin on the host.
    qkv = jnp.dot(y16, win_ref[...],
                  preferred_element_type=jnp.float32) + bin_ref[...]   # (R, 3E) f32

    qkv3 = qkv.reshape(TB, L, 3 * E)                       # f32, batch-major
    q = qkv3[:, :, :E].astype(jnp.bfloat16)                # cast once, pre-scaled
    k = qkv3[:, :, E:2 * E].astype(jnp.bfloat16)
    v = qkv3[:, :, 2 * E:].astype(jnp.bfloat16)

    head_outs = []
    # TODO(synk): for num_heads >= ~16 switch to lax.fori_loop to bound vreg live ranges.
    for h in range(num_heads):
        sl = slice(h * dh, (h + 1) * dh)
        # scores: batched over TB, contraction over dh (no materialized transpose)
        s = jnp.einsum("bqd,bkd->bqk", q[:, :, sl], k[:, :, sl],
                       preferred_element_type=jnp.float32)             # (TB, L, L) f32
        s = s - jnp.max(s, axis=-1, keepdims=True)
        p = jnp.exp(s)
        # TODO(synk): bf16 exp is a further win on v6e/v7x (not v5e); kept f32 for portability.
        r = pl.reciprocal(jnp.sum(p, axis=-1, keepdims=True), approx=True)  # (TB, L, 1)
        oh = jnp.einsum("bqk,bkd->bqd", p.astype(jnp.bfloat16), v[:, :, sl],
                        preferred_element_type=jnp.float32)             # (TB, L, dh)
        head_outs.append(oh * r)   # fold softmax normalization into PV, keep f32

    # assemble the full-width (lane-dense) attention slab in registers:
    # single cast, no masked narrow-lane stores, feeds one fused out_proj dot.
    attn_in = jnp.concatenate(head_outs, axis=-1).astype(jnp.bfloat16).reshape(R, E)
    attn = jnp.dot(attn_in, wout_ref[...],
                   preferred_element_type=jnp.float32) + bout_ref[...]  # (R, E)
    x1 = x + attn                      # dropout1 == identity (eval)

    # ---------------- feed-forward block (pre-norm) -------------------
    y2 = _layernorm(x1, g2_ref[...], bn2_ref[...]).astype(jnp.bfloat16)
    h1 = jnp.dot(y2, w1_ref[...],
                 preferred_element_type=jnp.float32) + bf1_ref[...]     # (R, 4E)
    h1 = jnp.maximum(h1, 0.0).astype(jnp.bfloat16)         # relu; inner dropout == identity
    ff = jnp.dot(h1, w2_ref[...],
                 preferred_element_type=jnp.float32) + bf2_ref[...]     # (R, E)

    o_ref[...] = (x1 + ff).reshape(TB, L, E)               # dropout2 == identity


def _pick_batch_tile(N, L, E):
    """Choose TB so TB*L >= ~256 (MXU M fill) but keep >=2 grid steps when N>=2."""
    cdiv = lambda a, b: -(-a // b)
    TB = max(1, min(N, cdiv(256, max(1, L))))
    if N >= 2 and cdiv(N, TB) < 2:
        TB = cdiv(N, 2)        # guarantee 2 parallel steps for v7x dual-TC
    # crude per-step activation budget (~8 MiB of f32 intermediates;
    # dominant slabs per row: qkv 12E + h1 16E + misc ~ 48E bytes).
    max_rows = max(L, (8 * 1024 * 1024) // max(1, 48 * E))
    TB = max(1, min(TB, max(1, max_rows // max(1, L))))
    return TB


def _vmem_limit_bytes():
    """Generation-aware VMEM limit: ~48 MiB on v7x (64 MiB phys), ~112 MiB on v5e/v6e."""
    try:
        cap = int(pltpu.get_tpu_info().vmem_capacity_bytes)
    except Exception:
        return None   # fall back to compiler default
    return max(16 * 1024 * 1024, min(cap - 16 * 1024 * 1024, 112 * 1024 * 1024))


def temporal_encoder_layer(src, params, num_heads):
    """src: (L, N, E) float32 — same convention as the PyTorch module."""
    L, N, E = src.shape
    assert E % num_heads == 0, "embed_dim must be divisible by num_heads"

    x = jnp.transpose(src, (1, 0, 2))  # (N, L, E): batch-major blocks for the grid

    TB = _pick_batch_tile(N, L, E)
    cdiv = lambda a, b: -(-a // b)
    n_tiles = cdiv(N, TB)
    Np = n_tiles * TB
    if Np != N:  # pad batch axis; padded rows produce finite garbage and are sliced off
        x = jnp.concatenate([x, jnp.zeros((Np - N, L, E), x.dtype)], axis=0)

    # Host-side (one-time) weight preparation: transpose so the kernel does plain
    # row-major matmuls, fold the 1/sqrt(dh) attention scale into the Q columns,
    # and cast matmul weights to bf16 (MXU-native operands).
    bf16, f32 = jnp.bfloat16, jnp.float32
    scale = 1.0 / math.sqrt(E // num_heads)
    w_in_t = params["w_in"].T.astype(f32).at[:, :E].multiply(scale)   # (E, 3E)
    b_in = params["b_in"].astype(f32).at[:E].multiply(scale)          # (3E,)
    row = lambda a: a.reshape(1, -1).astype(f32)
    weights = [
        row(params["ln1_g"]), row(params["ln1_b"]),
        w_in_t.astype(bf16),            b_in.reshape(1, -1),
        params["w_out"].T.astype(bf16), row(params["b_out"]),
        params["w1"].T.astype(bf16),    row(params["b1"]),
        params["w2"].T.astype(bf16),    row(params["b2"]),
        row(params["ln2_g"]), row(params["ln2_b"]),
    ]
    # TODO(synk): for E >= ~1536 stream w1/w2 over the 4E axis instead of keeping resident.

    # Weights never change across the grid: pass them untiled and resident in VMEM.
    resident = pl.BlockSpec(memory_space=pltpu.MemorySpace.VMEM)
    in_specs = [pl.BlockSpec((TB, L, E), lambda n: (n, 0, 0))] + [resident] * len(weights)

    out = pl.pallas_call(
        functools.partial(encoder_layer_kernel, num_heads=num_heads),
        out_shape=jax.ShapeDtypeStruct((Np, L, E), jnp.float32),
        grid=(n_tiles,),
        in_specs=in_specs,
        out_specs=pl.BlockSpec((TB, L, E), lambda n: (n, 0, 0)),
        compiler_params=pltpu.CompilerParams(
            dimension_semantics=("parallel",),
            vmem_limit_bytes=_vmem_limit_bytes(),
        ),
    )(x, *weights)

    out = out[:N]
    return jnp.transpose(out, (1, 0, 2))  # back to (L, N, E)


def reference(src, p, num_heads):
    """Pure-JAX f32 reference mirroring the PyTorch forward (dropout off)."""
    x = src  # (L, N, E)
    L, N, E = x.shape
    dh = E // num_heads

    def ln(t, g, b):
        mu = t.mean(-1, keepdims=True)
        var = ((t - mu) ** 2).mean(-1, keepdims=True)
        return (t - mu) / jnp.sqrt(var + EPS) * g + b

    # self-attention block
    y = ln(x, p["ln1_g"], p["ln1_b"])
    qkv = jnp.einsum("lne,fe->lnf", y, p["w_in"]) + p["b_in"]
    q, k, v = qkv[..., :E], qkv[..., E:2 * E], qkv[..., 2 * E:]
    q = q.reshape(L, N, num_heads, dh) / jnp.sqrt(dh)
    k = k.reshape(L, N, num_heads, dh)
    v = v.reshape(L, N, num_heads, dh)
    s = jnp.einsum("lnhd,mnhd->nhlm", q, k)
    pattn = jax.nn.softmax(s, axis=-1)
    o = jnp.einsum("nhlm,mnhd->lnhd", pattn, v).reshape(L, N, E)
    o = jnp.einsum("lne,fe->lnf", o, p["w_out"]) + p["b_out"]
    x1 = x + o

    # feed-forward block
    y2 = ln(x1, p["ln2_g"], p["ln2_b"])
    h1 = jax.nn.relu(jnp.einsum("lne,fe->lnf", y2, p["w1"]) + p["b1"])
    ff = jnp.einsum("lnf,ef->lne", h1, p["w2"]) + p["b2"]
    return x1 + ff


def init_params(key, embed_dim):
    E = embed_dim
    ks = jax.random.split(key, 10)
    n = lambda k, shape, s=0.02: (s * jax.random.normal(k, shape)).astype(jnp.float32)
    return {
        "ln1_g": (1.0 + n(ks[0], (E,), 0.1)),
        "ln1_b": n(ks[1], (E,), 0.1),
        "w_in": n(ks[2], (3 * E, E)),
        "b_in": n(ks[3], (3 * E,), 0.01),
        "w_out": n(ks[4], (E, E)),
        "b_out": n(ks[5], (E,), 0.01),
        "w1": n(ks[6], (4 * E, E)),
        "b1": n(ks[7], (4 * E,), 0.01),
        "w2": n(ks[8], (E, 4 * E)),
        "b2": n(ks[9], (E,), 0.01),
        "ln2_g": jnp.ones((E,), jnp.float32),
        "ln2_b": jnp.zeros((E,), jnp.float32),
    }


if __name__ == "__main__":
    # Small shapes consistent with the module: seq L=8, batch N=2, embed E=32, heads=8.
    L, N, E, H = 8, 2, 32, 8
    key = jax.random.PRNGKey(0)
    k_src, k_par = jax.random.split(key)
    src = jax.random.normal(k_src, (L, N, E), dtype=jnp.float32)
    params = init_params(k_par, E)

    out = jax.block_until_ready(temporal_encoder_layer(src, params, num_heads=H))
    ref = jax.block_until_ready(reference(src, params, H))

    assert out.shape == (L, N, E)
    max_err = float(jnp.max(jnp.abs(out - ref)))
    # bf16 MXU operands (f32 accumulation) + approx reciprocal -> loosened tolerance.
    assert jnp.allclose(out, ref, atol=2e-2, rtol=2e-2), f"max_err={max_err}"

    print("KERNEL_OK")
</pallas_src>

<mosaic_0001>
module attributes {stable_mosaic.version = 11 : i64} {
  func.func @encoder_layer_kernel(%arg0: i32, %arg1: memref<1x8x32xf32, #tpu.memory_space<vmem>>, %arg2: memref<1x32xf32, #tpu.memory_space<vmem>>, %arg3: memref<1x32xf32, #tpu.memory_space<vmem>>, %arg4: memref<32x96xbf16, #tpu.memory_space<vmem>>, %arg5: memref<1x96xf32, #tpu.memory_space<vmem>>, %arg6: memref<32x32xbf16, #tpu.memory_space<vmem>>, %arg7: memref<1x32xf32, #tpu.memory_space<vmem>>, %arg8: memref<32x128xbf16, #tpu.memory_space<vmem>>, %arg9: memref<1x128xf32, #tpu.memory_space<vmem>>, %arg10: memref<128x32xbf16, #tpu.memory_space<vmem>>, %arg11: memref<1x32xf32, #tpu.memory_space<vmem>>, %arg12: memref<1x32xf32, #tpu.memory_space<vmem>>, %arg13: memref<1x32xf32, #tpu.memory_space<vmem>>, %arg14: memref<1x8x32xf32, #tpu.memory_space<vmem>>) attributes {dimension_semantics = [#tpu.dimension_semantics<parallel>], iteration_bounds = array<i64: 2>, scalar_prefetch = 0 : i64, scratch_operands = 0 : i64, tpu.core_type = #tpu.core_type<tc>, window_params = [{transform_indices = @transform_0, window_bounds = array<i64: 1, 8, 32>}, {pipeline_mode = #tpu.pipeline_mode<synchronous>, transform_indices = @transform_1, window_bounds = array<i64: 1, 32>}, {pipeline_mode = #tpu.pipeline_mode<synchronous>, transform_indices = @transform_2, window_bounds = array<i64: 1, 32>}, {pipeline_mode = #tpu.pipeline_mode<synchronous>, transform_indices = @transform_3, window_bounds = array<i64: 32, 96>}, {pipeline_mode = #tpu.pipeline_mode<synchronous>, transform_indices = @transform_4, window_bounds = array<i64: 1, 96>}, {pipeline_mode = #tpu.pipeline_mode<synchronous>, transform_indices = @transform_5, window_bounds = array<i64: 32, 32>}, {pipeline_mode = #tpu.pipeline_mode<synchronous>, transform_indices = @transform_6, window_bounds = array<i64: 1, 32>}, {pipeline_mode = #tpu.pipeline_mode<synchronous>, transform_indices = @transform_7, window_bounds = array<i64: 32, 128>}, {pipeline_mode = #tpu.pipeline_mode<synchronous>, transform_indices = @transform_8, window_bounds = array<i64: 1, 128>}, {pipeline_mode = #tpu.pipeline_mode<synchronous>, transform_indices = @transform_9, window_bounds = array<i64: 128, 32>}, {pipeline_mode = #tpu.pipeline_mode<synchronous>, transform_indices = @transform_10, window_bounds = array<i64: 1, 32>}, {pipeline_mode = #tpu.pipeline_mode<synchronous>, transform_indices = @transform_11, window_bounds = array<i64: 1, 32>}, {pipeline_mode = #tpu.pipeline_mode<synchronous>, transform_indices = @transform_12, window_bounds = array<i64: 1, 32>}, {transform_indices = @transform_13, window_bounds = array<i64: 1, 8, 32>}]} {
    %c0 = arith.constant 0 : index
    %c0_0 = arith.constant 0 : index
    %c0_1 = arith.constant 0 : index
    %0 = vector.load %arg1[%c0, %c0_0, %c0_1] : memref<1x8x32xf32, #tpu.memory_space<vmem>>, vector<1x8x32xf32>
    %1 = vector.shape_cast %0 : vector<1x8x32xf32> to vector<8x32xf32>
    %c0_2 = arith.constant 0 : index
    %c0_3 = arith.constant 0 : index
    %2 = vector.load %arg2[%c0_2, %c0_3] : memref<1x32xf32, #tpu.memory_space<vmem>>, vector<1x32xf32>
    %c0_4 = arith.constant 0 : index
    %c0_5 = arith.constant 0 : index
    %3 = vector.load %arg3[%c0_4, %c0_5] : memref<1x32xf32, #tpu.memory_space<vmem>>, vector<1x32xf32>
    %cst = arith.constant dense<0.000000e+00> : vector<8xf32>
    %4 = vector.multi_reduction <add>, %1, %cst [1] : vector<8x32xf32> to vector<8xf32>
    %5 = vector.shape_cast %4 : vector<8xf32> to vector<8x1xf32>
    %cst_6 = arith.constant 3.200000e+01 : f32
    %6 = vector.broadcast %cst_6 : f32 to vector<8x1xf32>
    %7 = arith.divf %5, %6 : vector<8x1xf32>
    %8 = vector.broadcast %7 : vector<8x1xf32> to vector<8x32xf32>
    %9 = arith.subf %1, %8 : vector<8x32xf32>
    %10 = arith.mulf %9, %9 : vector<8x32xf32>
    %cst_7 = arith.constant dense<0.000000e+00> : vector<8xf32>
    %11 = vector.multi_reduction <add>, %10, %cst_7 [1] : vector<8x32xf32> to vector<8xf32>
    %12 = vector.shape_cast %11 : vector<8xf32> to vector<8x1xf32>
    %cst_8 = arith.constant 3.200000e+01 : f32
    %13 = vector.broadcast %cst_8 : f32 to vector<8x1xf32>
    %14 = arith.divf %12, %13 : vector<8x1xf32>
    %15 = vector.broadcast %7 : vector<8x1xf32> to vector<8x32xf32>
    %16 = arith.subf %1, %15 : vector<8x32xf32>
    %cst_9 = arith.constant 9.99999974E-6 : f32
    %17 = vector.broadcast %cst_9 : f32 to vector<8x1xf32>
    %18 = arith.addf %14, %17 : vector<8x1xf32>
    %19 = math.rsqrt %18 : vector<8x1xf32>
    %20 = vector.broadcast %19 : vector<8x1xf32> to vector<8x32xf32>
    %21 = arith.mulf %16, %20 : vector<8x32xf32>
    %22 = vector.broadcast %2 : vector<1x32xf32> to vector<8x32xf32>
    %23 = arith.mulf %21, %22 : vector<8x32xf32>
    %24 = vector.broadcast %3 : vector<1x32xf32> to vector<8x32xf32>
    %25 = arith.addf %23, %24 : vector<8x32xf32>
    %26 = arith.truncf %25 : vector<8x32xf32> to vector<8x32xbf16>
    %c0_10 = arith.constant 0 : index
    %c0_11 = arith.constant 0 : index
    %27 = vector.load %arg4[%c0_10, %c0_11] : memref<32x96xbf16, #tpu.memory_space<vmem>>, vector<32x96xbf16>
    %cst_12 = arith.constant dense<0.000000e+00> : vector<8x96xf32>
    %28 = tpu.matmul %26, %27, %cst_12 {dimension_numbers = #tpu.dot_dimension_numbers<[1], [0], [0], [1], [0, 0, 1, 1], [], []>} : vector<8x32xbf16>, vector<32x96xbf16>, vector<8x96xf32> -> vector<8x96xf32>
    %c0_13 = arith.constant 0 : index
    %c0_14 = arith.constant 0 : index
    %29 = vector.load %arg5[%c0_13, %c0_14] : memref<1x96xf32, #tpu.memory_space<vmem>>, vector<1x96xf32>
    %30 = vector.broadcast %29 : vector<1x96xf32> to vector<8x96xf32>
    %31 = arith.addf %28, %30 : vector<8x96xf32>
    %32 = vector.shape_cast %31 : vector<8x96xf32> to vector<1x8x96xf32>
    %33 = vector.extract_strided_slice %32 {offsets = [0, 0, 0], sizes = [1, 8, 32], strides = [1, 1, 1]} : vector<1x8x96xf32> to vector<1x8x32xf32>
    %34 = arith.truncf %33 : vector<1x8x32xf32> to vector<1x8x32xbf16>
    %35 = vector.extract_strided_slice %32 {offsets = [0, 0, 32], sizes = [1, 8, 32], strides = [1, 1, 1]} : vector<1x8x96xf32> to vector<1x8x32xf32>
    %36 = arith.truncf %35 : vector<1x8x32xf32> to vector<1x8x32xbf16>
    %37 = vector.extract_strided_slice %32 {offsets = [0, 0, 64], sizes = [1, 8, 32], strides = [1, 1, 1]} : vector<1x8x96xf32> to vector<1x8x32xf32>
    %38 = arith.truncf %37 : vector<1x8x32xf32> to vector<1x8x32xbf16>
    %39 = vector.extract_strided_slice %34 {offsets = [0, 0, 0], sizes = [1, 8, 4], strides = [1, 1, 1]} : vector<1x8x32xbf16> to vector<1x8x4xbf16>
    %40 = vector.extract_strided_slice %36 {offsets = [0, 0, 0], sizes = [1, 8, 4], strides = [1, 1, 1]} : vector<1x8x32xbf16> to vector<1x8x4xbf16>
    "tpu.trace_start"() <{level = 10 : i32, message = "bqd,bkd->bqk"}> : () -> ()
    %cst_15 = arith.constant dense<0.000000e+00> : vector<1x8x8xf32>
    %41 = tpu.matmul %39, %40, %cst_15 {dimension_numbers = #tpu.dot_dimension_numbers<[2], [2], [1], [1], [0, 0, 0, 1, 1, 1], [0], [0]>} : vector<1x8x4xbf16>, vector<1x8x4xbf16>, vector<1x8x8xf32> -> vector<1x8x8xf32>
    "tpu.trace_stop"() : () -> ()
    %cst_16 = arith.constant dense<0xFF800000> : vector<1x8xf32>
    %42 = vector.multi_reduction <maximumf>, %41, %cst_16 [2] : vector<1x8x8xf32> to vector<1x8xf32>
    %43 = vector.shape_cast %42 : vector<1x8xf32> to vector<1x8x1xf32>
    %44 = vector.broadcast %43 : vector<1x8x1xf32> to vector<1x8x8xf32>
    %45 = arith.subf %41, %44 : vector<1x8x8xf32>
    %46 = math.exp %45 : vector<1x8x8xf32>
    %cst_17 = arith.constant dense<0.000000e+00> : vector<1x8xf32>
    %47 = vector.multi_reduction <add>, %46, %cst_17 [2] : vector<1x8x8xf32> to vector<1x8xf32>
    %48 = vector.shape_cast %47 : vector<1x8xf32> to vector<1x8x1xf32>
    %49 = tpu.reciprocal %48 {approx = true} : vector<1x8x1xf32> -> vector<1x8x1xf32>
    %50 = arith.truncf %46 : vector<1x8x8xf32> to vector<1x8x8xbf16>
    %51 = vector.extract_strided_slice %38 {offsets = [0, 0, 0], sizes = [1, 8, 4], strides = [1, 1, 1]} : vector<1x8x32xbf16> to vector<1x8x4xbf16>
    "tpu.trace_start"() <{level = 10 : i32, message = "bqk,bkd->bqd"}> : () -> ()
    %cst_18 = arith.constant dense<0.000000e+00> : vector<1x8x4xf32>
    %52 = tpu.matmul %50, %51, %cst_18 {dimension_numbers = #tpu.dot_dimension_numbers<[2], [1], [1], [2], [0, 0, 0, 1, 1, 2], [0], [0]>} : vector<1x8x8xbf16>, vector<1x8x4xbf16>, vector<1x8x4xf32> -> vector<1x8x4xf32>
    "tpu.trace_stop"() : () -> ()
    %53 = vector.broadcast %49 : vector<1x8x1xf32> to vector<1x8x4xf32>
    %54 = arith.mulf %52, %53 : vector<1x8x4xf32>
    %55 = vector.extract_strided_slice %34 {offsets = [0, 0, 4], sizes = [1, 8, 4], strides = [1, 1, 1]} : vector<1x8x32xbf16> to vector<1x8x4xbf16>
    %56 = vector.extract_strided_slice %36 {offsets = [0, 0, 4], sizes = [1, 8, 4], strides = [1, 1, 1]} : vector<1x8x32xbf16> to vector<1x8x4xbf16>
    "tpu.trace_start"() <{level = 10 : i32, message = "bqd,bkd->bqk"}> : () -> ()
    %cst_19 = arith.constant dense<0.000000e+00> : vector<1x8x8xf32>
    %57 = tpu.matmul %55, %56, %cst_19 {dimension_numbers = #tpu.dot_dimension_numbers<[2], [2], [1], [1], [0, 0, 0, 1, 1, 1], [0], [0]>} : vector<1x8x4xbf16>, vector<1x8x4xbf16>, vector<1x8x8xf32> -> vector<1x8x8xf32>
    "tpu.trace_stop"() : () -> ()
    %cst_20 = arith.constant dense<0xFF800000> : vector<1x8xf32>
    %58 = vector.multi_reduction <maximumf>, %57, %cst_20 [2] : vector<1x8x8xf32> to vector<1x8xf32>
    %59 = vector.shape_cast %58 : vector<1x8xf32> to vector<1x8x1xf32>
    %60 = vector.broadcast %59 : vector<1x8x1xf32> to vector<1x8x8xf32>
    %61 = arith.subf %57, %60 : vector<1x8x8xf32>
    %62 = math.exp %61 : vector<1x8x8xf32>
    %cst_21 = arith.constant dense<0.000000e+00> : vector<1x8xf32>
    %63 = vector.multi_reduction <add>, %62, %cst_21 [2] : vector<1x8x8xf32> to vector<1x8xf32>
    %64 = vector.shape_cast %63 : vector<1x8xf32> to vector<1x8x1xf32>
    %65 = tpu.reciprocal %64 {approx = true} : vector<1x8x1xf32> -> vector<1x8x1xf32>
    %66 = arith.truncf %62 : vector<1x8x8xf32> to vector<1x8x8xbf16>
    %67 = vector.extract_strided_slice %38 {offsets = [0, 0, 4], sizes = [1, 8, 4], strides = [1, 1, 1]} : vector<1x8x32xbf16> to vector<1x8x4xbf16>
    "tpu.trace_start"() <{level = 10 : i32, message = "bqk,bkd->bqd"}> : () -> ()
    %cst_22 = arith.constant dense<0.000000e+00> : vector<1x8x4xf32>
    %68 = tpu.matmul %66, %67, %cst_22 {dimension_numbers = #tpu.dot_dimension_numbers<[2], [1], [1], [2], [0, 0, 0, 1, 1, 2], [0], [0]>} : vector<1x8x8xbf16>, vector<1x8x4xbf16>, vector<1x8x4xf32> -> vector<1x8x4xf32>
    "tpu.trace_stop"() : () -> ()
    %69 = vector.broadcast %65 : vector<1x8x1xf32> to vector<1x8x4xf32>
    %70 = arith.mulf %68, %69 : vector<1x8x4xf32>
    %71 = vector.extract_strided_slice %34 {offsets = [0, 0, 8], sizes = [1, 8, 4], strides = [1, 1, 1]} : vector<1x8x32xbf16> to vector<1x8x4xbf16>
    %72 = vector.extract_strided_slice %36 {offsets = [0, 0, 8], sizes = [1, 8, 4], strides = [1, 1, 1]} : vector<1x8x32xbf16> to vector<1x8x4xbf16>
    "tpu.trace_start"() <{level = 10 : i32, message = "bqd,bkd->bqk"}> : () -> ()
    %cst_23 = arith.constant dense<0.000000e+00> : vector<1x8x8xf32>
    %73 = tpu.matmul %71, %72, %cst_23 {dimension_numbers = #tpu.dot_dimension_numbers<[2], [2], [1], [1], [0, 0, 0, 1, 1, 1], [0], [0]>} : vector<1x8x4xbf16>, vector<1x8x4xbf16>, vector<1x8x8xf32> -> vector<1x8x8xf32>
    "tpu.trace_stop"() : () -> ()
    %cst_24 = arith.constant dense<0xFF800000> : vector<1x8xf32>
    %74 = vector.multi_reduction <maximumf>, %73, %cst_24 [2] : vector<1x8x8xf32> to vector<1x8xf32>
    %75 = vector.shape_cast %74 : vector<1x8xf32> to vector<1x8x1xf32>
    %76 = vector.broadcast %75 : vector<1x8x1xf32> to vector<1x8x8xf32>
    %77 = arith.subf %73, %76 : vector<1x8x8xf32>
    %78 = math.exp %77 : vector<1x8x8xf32>
    %cst_25 = arith.constant dense<0.000000e+00> : vector<1x8xf32>
    %79 = vector.multi_reduction <add>, %78, %cst_25 [2] : vector<1x8x8xf32> to vector<1x8xf32>
    %80 = vector.shape_cast %79 : vector<1x8xf32> to vector<1x8x1xf32>
    %81 = tpu.reciprocal %80 {approx = true} : vector<1x8x1xf32> -> vector<1x8x1xf32>
    %82 = arith.truncf %78 : vector<1x8x8xf32> to vector<1x8x8xbf16>
    %83 = vector.extract_strided_slice %38 {offsets = [0, 0, 8], sizes = [1, 8, 4], strides = [1, 1, 1]} : vector<1x8x32xbf16> to vector<1x8x4xbf16>
    "tpu.trace_start"() <{level = 10 : i32, message = "bqk,bkd->bqd"}> : () -> ()
    %cst_26 = arith.constant dense<0.000000e+00> : vector<1x8x4xf32>
    %84 = tpu.matmul %82, %83, %cst_26 {dimension_numbers = #tpu.dot_dimension_numbers<[2], [1], [1], [2], [0, 0, 0, 1, 1, 2], [0], [0]>} : vector<1x8x8xbf16>, vector<1x8x4xbf16>, vector<1x8x4xf32> -> vector<1x8x4xf32>
    "tpu.trace_stop"() : () -> ()
    %85 = vector.broadcast %81 : vector<1x8x1xf32> to vector<1x8x4xf32>
    %86 = arith.mulf %84, %85 : vector<1x8x4xf32>
    %87 = vector.extract_strided_slice %34 {offsets = [0, 0, 12], sizes = [1, 8, 4], strides = [1, 1, 1]} : vector<1x8x32xbf16> to vector<1x8x4xbf16>
    %88 = vector.extract_strided_slice %36 {offsets = [0, 0, 12], sizes = [1, 8, 4], strides = [1, 1, 1]} : vector<1x8x32xbf16> to vector<1x8x4xbf16>
    "tpu.trace_start"() <{level = 10 : i32, message = "bqd,bkd->bqk"}> : () -> ()
    %cst_27 = arith.constant dense<0.000000e+00> : vector<1x8x8xf32>
    %89 = tpu.matmul %87, %88, %cst_27 {dimension_numbers = #tpu.dot_dimension_numbers<[2], [2], [1], [1], [0, 0, 0, 1, 1, 1], [0], [0]>} : vector<1x8x4xbf16>, vector<1x8x4xbf16>, vector<1x8x8xf32> -> vector<1x8x8xf32>
    "tpu.trace_stop"() : () -> ()
    %cst_28 = arith.constant dense<0xFF800000> : vector<1x8xf32>
    %90 = vector.multi_reduction <maximumf>, %89, %cst_28 [2] : vector<1x8x8xf32> to vector<1x8xf32>
    %91 = vector.shape_cast %90 : vector<1x8xf32> to vector<1x8x1xf32>
    %92 = vector.broadcast %91 : vector<1x8x1xf32> to vector<1x8x8xf32>
    %93 = arith.subf %89, %92 : vector<1x8x8xf32>
    %94 = math.exp %93 : vector<1x8x8xf32>
    %cst_29 = arith.constant dense<0.000000e+00> : vector<1x8xf32>
    %95 = vector.multi_reduction <add>, %94, %cst_29 [2] : vector<1x8x8xf32> to vector<1x8xf32>
    %96 = vector.shape_cast %95 : vector<1x8xf32> to vector<1x8x1xf32>
    %97 = tpu.reciprocal %96 {approx = true} : vector<1x8x1xf32> -> vector<1x8x1xf32>
    %98 = arith.truncf %94 : vector<1x8x8xf32> to vector<1x8x8xbf16>
    %99 = vector.extract_strided_slice %38 {offsets = [0, 0, 12], sizes = [1, 8, 4], strides = [1, 1, 1]} : vector<1x8x32xbf16> to vector<1x8x4xbf16>
    "tpu.trace_start"() <{level = 10 : i32, message = "bqk,bkd->bqd"}> : () -> ()
    %cst_30 = arith.constant dense<0.000000e+00> : vector<1x8x4xf32>
    %100 = tpu.matmul %98, %99, %cst_30 {dimension_numbers = #tpu.dot_dimension_numbers<[2], [1], [1], [2], [0, 0, 0, 1, 1, 2], [0], [0]>} : vector<1x8x8xbf16>, vector<1x8x4xbf16>, vector<1x8x4xf32> -> vector<1x8x4xf32>
    "tpu.trace_stop"() : () -> ()
    %101 = vector.broadcast %97 : vector<1x8x1xf32> to vector<1x8x4xf32>
    %102 = arith.mulf %100, %101 : vector<1x8x4xf32>
    %103 = vector.extract_strided_slice %34 {offsets = [0, 0, 16], sizes = [1, 8, 4], strides = [1, 1, 1]} : vector<1x8x32xbf16> to vector<1x8x4xbf16>
    %104 = vector.extract_strided_slice %36 {offsets = [0, 0, 16], sizes = [1, 8, 4], strides = [1, 1, 1]} : vector<1x8x32xbf16> to vector<1x8x4xbf16>
    "tpu.trace_start"() <{level = 10 : i32, message = "bqd,bkd->bqk"}> : () -> ()
    %cst_31 = arith.constant dense<0.000000e+00> : vector<1x8x8xf32>
    %105 = tpu.matmul %103, %104, %cst_31 {dimension_numbers = #tpu.dot_dimension_numbers<[2], [2], [1], [1], [0, 0, 0, 1, 1, 1], [0], [0]>} : vector<1x8x4xbf16>, vector<1x8x4xbf16>, vector<1x8x8xf32> -> vector<1x8x8xf32>
    "tpu.trace_stop"() : () -> ()
    %cst_32 = arith.constant dense<0xFF800000> : vector<1x8xf32>
    %106 = vector.multi_reduction <maximumf>, %105, %cst_32 [2] : vector<1x8x8xf32> to vector<1x8xf32>
    %107 = vector.shape_cast %106 : vector<1x8xf32> to vector<1x8x1xf32>
    %108 = vector.broadcast %107 : vector<1x8x1xf32> to vector<1x8x8xf32>
    %109 = arith.subf %105, %108 : vector<1x8x8xf32>
    %110 = math.exp %109 : vector<1x8x8xf32>
    %cst_33 = arith.constant dense<0.000000e+00> : vector<1x8xf32>
    %111 = vector.multi_reduction <add>, %110, %cst_33 [2] : vector<1x8x8xf32> to vector<1x8xf32>
    %112 = vector.shape_cast %111 : vector<1x8xf32> to vector<1x8x1xf32>
    %113 = tpu.reciprocal %112 {approx = true} : vector<1x8x1xf32> -> vector<1x8x1xf32>
    %114 = arith.truncf %110 : vector<1x8x8xf32> to vector<1x8x8xbf16>
    %115 = vector.extract_strided_slice %38 {offsets = [0, 0, 16], sizes = [1, 8, 4], strides = [1, 1, 1]} : vector<1x8x32xbf16> to vector<1x8x4xbf16>
    "tpu.trace_start"() <{level = 10 : i32, message = "bqk,bkd->bqd"}> : () -> ()
    %cst_34 = arith.constant dense<0.000000e+00> : vector<1x8x4xf32>
    %116 = tpu.matmul %114, %115, %cst_34 {dimension_numbers = #tpu.dot_dimension_numbers<[2], [1], [1], [2], [0, 0, 0, 1, 1, 2], [0], [0]>} : vector<1x8x8xbf16>, vector<1x8x4xbf16>, vector<1x8x4xf32> -> vector<1x8x4xf32>
    "tpu.trace_stop"() : () -> ()
    %117 = vector.broadcast %113 : vector<1x8x1xf32> to vector<1x8x4xf32>
    %118 = arith.mulf %116, %117 : vector<1x8x4xf32>
    %119 = vector.extract_strided_slice %34 {offsets = [0, 0, 20], sizes = [1, 8, 4], strides = [1, 1, 1]} : vector<1x8x32xbf16> to vector<1x8x4xbf16>
    %120 = vector.extract_strided_slice %36 {offsets = [0, 0, 20], sizes = [1, 8, 4], strides = [1, 1, 1]} : vector<1x8x32xbf16> to vector<1x8x4xbf16>
    "tpu.trace_start"() <{level = 10 : i32, message = "bqd,bkd->bqk"}> : () -> ()
    %cst_35 = arith.constant dense<0.000000e+00> : vector<1x8x8xf32>
    %121 = tpu.matmul %119, %120, %cst_35 {dimension_numbers = #tpu.dot_dimension_numbers<[2], [2], [1], [1], [0, 0, 0, 1, 1, 1], [0], [0]>} : vector<1x8x4xbf16>, vector<1x8x4xbf16>, vector<1x8x8xf32> -> vector<1x8x8xf32>
    "tpu.trace_stop"() : () -> ()
    %cst_36 = arith.constant dense<0xFF800000> : vector<1x8xf32>
    %122 = vector.multi_reduction <maximumf>, %121, %cst_36 [2] : vector<1x8x8xf32> to vector<1x8xf32>
    %123 = vector.shape_cast %122 : vector<1x8xf32> to vector<1x8x1xf32>
    %124 = vector.broadcast %123 : vector<1x8x1xf32> to vector<1x8x8xf32>
    %125 = arith.subf %121, %124 : vector<1x8x8xf32>
    %126 = math.exp %125 : vector<1x8x8xf32>
    %cst_37 = arith.constant dense<0.000000e+00> : vector<1x8xf32>
    %127 = vector.multi_reduction <add>, %126, %cst_37 [2] : vector<1x8x8xf32> to vector<1x8xf32>
    %128 = vector.shape_cast %127 : vector<1x8xf32> to vector<1x8x1xf32>
    %129 = tpu.reciprocal %128 {approx = true} : vector<1x8x1xf32> -> vector<1x8x1xf32>
    %130 = arith.truncf %126 : vector<1x8x8xf32> to vector<1x8x8xbf16>
    %131 = vector.extract_strided_slice %38 {offsets = [0, 0, 20], sizes = [1, 8, 4], strides = [1, 1, 1]} : vector<1x8x32xbf16> to vector<1x8x4xbf16>
    "tpu.trace_start"() <{level = 10 : i32, message = "bqk,bkd->bqd"}> : () -> ()
    %cst_38 = arith.constant dense<0.000000e+00> : vector<1x8x4xf32>
    %132 = tpu.matmul %130, %131, %cst_38 {dimension_numbers = #tpu.dot_dimension_numbers<[2], [1], [1], [2], [0, 0, 0, 1, 1, 2], [0], [0]>} : vector<1x8x8xbf16>, vector<1x8x4xbf16>, vector<1x8x4xf32> -> vector<1x8x4xf32>
    "tpu.trace_stop"() : () -> ()
    %133 = vector.broadcast %129 : vector<1x8x1xf32> to vector<1x8x4xf32>
    %134 = arith.mulf %132, %133 : vector<1x8x4xf32>
    %135 = vector.extract_strided_slice %34 {offsets = [0, 0, 24], sizes = [1, 8, 4], strides = [1, 1, 1]} : vector<1x8x32xbf16> to vector<1x8x4xbf16>
    %136 = vector.extract_strided_slice %36 {offsets = [0, 0, 24], sizes = [1, 8, 4], strides = [1, 1, 1]} : vector<1x8x32xbf16> to vector<1x8x4xbf16>
    "tpu.trace_start"() <{level = 10 : i32, message = "bqd,bkd->bqk"}> : () -> ()
    %cst_39 = arith.constant dense<0.000000e+00> : vector<1x8x8xf32>
    %137 = tpu.matmul %135, %136, %cst_39 {dimension_numbers = #tpu.dot_dimension_numbers<[2], [2], [1], [1], [0, 0, 0, 1, 1, 1], [0], [0]>} : vector<1x8x4xbf16>, vector<1x8x4xbf16>, vector<1x8x8xf32> -> vector<1x8x8xf32>
    "tpu.trace_stop"() : () -> ()
    %cst_40 = arith.constant dense<0xFF800000> : vector<1x8xf32>
    %138 = vector.multi_reduction <maximumf>, %137, %cst_40 [2] : vector<1x8x8xf32> to vector<1x8xf32>
    %139 = vector.shape_cast %138 : vector<1x8xf32> to vector<1x8x1xf32>
    %140 = vector.broadcast %139 : vector<1x8x1xf32> to vector<1x8x8xf32>
    %141 = arith.subf %137, %140 : vector<1x8x8xf32>
    %142 = math.exp %141 : vector<1x8x8xf32>
    %cst_41 = arith.constant dense<0.000000e+00> : vector<1x8xf32>
    %143 = vector.multi_reduction <add>, %142, %cst_41 [2] : vector<1x8x8xf32> to vector<1x8xf32>
    %144 = vector.shape_cast %143 : vector<1x8xf32> to vector<1x8x1xf32>
    %145 = tpu.reciprocal %144 {approx = true} : vector<1x8x1xf32> -> vector<1x8x1xf32>
    %146 = arith.truncf %142 : vector<1x8x8xf32> to vector<1x8x8xbf16>
    %147 = vector.extract_strided_slice %38 {offsets = [0, 0, 24], sizes = [1, 8, 4], strides = [1, 1, 1]} : vector<1x8x32xbf16> to vector<1x8x4xbf16>
    "tpu.trace_start"() <{level = 10 : i32, message = "bqk,bkd->bqd"}> : () -> ()
    %cst_42 = arith.constant dense<0.000000e+00> : vector<1x8x4xf32>
    %148 = tpu.matmul %146, %147, %cst_42 {dimension_numbers = #tpu.dot_dimension_numbers<[2], [1], [1], [2], [0, 0, 0, 1, 1, 2], [0], [0]>} : vector<1x8x8xbf16>, vector<1x8x4xbf16>, vector<1x8x4xf32> -> vector<1x8x4xf32>
    "tpu.trace_stop"() : () -> ()
    %149 = vector.broadcast %145 : vector<1x8x1xf32> to vector<1x8x4xf32>
    %150 = arith.mulf %148, %149 : vector<1x8x4xf32>
    %151 = vector.extract_strided_slice %34 {offsets = [0, 0, 28], sizes = [1, 8, 4], strides = [1, 1, 1]} : vector<1x8x32xbf16> to vector<1x8x4xbf16>
    %152 = vector.extract_strided_slice %36 {offsets = [0, 0, 28], sizes = [1, 8, 4], strides = [1, 1, 1]} : vector<1x8x32xbf16> to vector<1x8x4xbf16>
    "tpu.trace_start"() <{level = 10 : i32, message = "bqd,bkd->bqk"}> : () -> ()
    %cst_43 = arith.constant dense<0.000000e+00> : vector<1x8x8xf32>
    %153 = tpu.matmul %151, %152, %cst_43 {dimension_numbers = #tpu.dot_dimension_numbers<[2], [2], [1], [1], [0, 0, 0, 1, 1, 1], [0], [0]>} : vector<1x8x4xbf16>, vector<1x8x4xbf16>, vector<1x8x8xf32> -> vector<1x8x8xf32>
    "tpu.trace_stop"() : () -> ()
    %cst_44 = arith.constant dense<0xFF800000> : vector<1x8xf32>
    %154 = vector.multi_reduction <maximumf>, %153, %cst_44 [2] : vector<1x8x8xf32> to vector<1x8xf32>
    %155 = vector.shape_cast %154 : vector<1x8xf32> to vector<1x8x1xf32>
    %156 = vector.broadcast %155 : vector<1x8x1xf32> to vector<1x8x8xf32>
    %157 = arith.subf %153, %156 : vector<1x8x8xf32>
    %158 = math.exp %157 : vector<1x8x8xf32>
    %cst_45 = arith.constant dense<0.000000e+00> : vector<1x8xf32>
    %159 = vector.multi_reduction <add>, %158, %cst_45 [2] : vector<1x8x8xf32> to vector<1x8xf32>
    %160 = vector.shape_cast %159 : vector<1x8xf32> to vector<1x8x1xf32>
    %161 = tpu.reciprocal %160 {approx = true} : vector<1x8x1xf32> -> vector<1x8x1xf32>
    %162 = arith.truncf %158 : vector<1x8x8xf32> to vector<1x8x8xbf16>
    %163 = vector.extract_strided_slice %38 {offsets = [0, 0, 28], sizes = [1, 8, 4], strides = [1, 1, 1]} : vector<1x8x32xbf16> to vector<1x8x4xbf16>
    "tpu.trace_start"() <{level = 10 : i32, message = "bqk,bkd->bqd"}> : () -> ()
    %cst_46 = arith.constant dense<0.000000e+00> : vector<1x8x4xf32>
    %164 = tpu.matmul %162, %163, %cst_46 {dimension_numbers = #tpu.dot_dimension_numbers<[2], [1], [1], [2], [0, 0, 0, 1, 1, 2], [0], [0]>} : vector<1x8x8xbf16>, vector<1x8x4xbf16>, vector<1x8x4xf32> -> vector<1x8x4xf32>
    "tpu.trace_stop"() : () -> ()
    %165 = vector.broadcast %161 : vector<1x8x1xf32> to vector<1x8x4xf32>
    %166 = arith.mulf %164, %165 : vector<1x8x4xf32>
    %167 = tpu.concatenate %54, %70, %86, %102, %118, %134, %150, %166 in 2 : vector<1x8x4xf32>, vector<1x8x4xf32>, vector<1x8x4xf32>, vector<1x8x4xf32>, vector<1x8x4xf32>, vector<1x8x4xf32>, vector<1x8x4xf32>, vector<1x8x4xf32> -> vector<1x8x32xf32>
    %168 = arith.truncf %167 : vector<1x8x32xf32> to vector<1x8x32xbf16>
    %169 = vector.shape_cast %168 : vector<1x8x32xbf16> to vector<8x32xbf16>
    %c0_47 = arith.constant 0 : index
    %c0_48 = arith.constant 0 : index
    %170 = vector.load %arg6[%c0_47, %c0_48] : memref<32x32xbf16, #tpu.memory_space<vmem>>, vector<32x32xbf16>
    %cst_49 = arith.constant dense<0.000000e+00> : vector<8x32xf32>
    %171 = tpu.matmul %169, %170, %cst_49 {dimension_numbers = #tpu.dot_dimension_numbers<[1], [0], [0], [1], [0, 0, 1, 1], [], []>} : vector<8x32xbf16>, vector<32x32xbf16>, vector<8x32xf32> -> vector<8x32xf32>
    %c0_50 = arith.constant 0 : index
    %c0_51 = arith.constant 0 : index
    %172 = vector.load %arg7[%c0_50, %c0_51] : memref<1x32xf32, #tpu.memory_space<vmem>>, vector<1x32xf32>
    %173 = vector.broadcast %172 : vector<1x32xf32> to vector<8x32xf32>
    %174 = arith.addf %171, %173 : vector<8x32xf32>
    %175 = arith.addf %1, %174 : vector<8x32xf32>
    %c0_52 = arith.constant 0 : index
    %c0_53 = arith.constant 0 : index
    %176 = vector.load %arg12[%c0_52, %c0_53] : memref<1x32xf32, #tpu.memory_space<vmem>>, vector<1x32xf32>
    %c0_54 = arith.constant 0 : index
    %c0_55 = arith.constant 0 : index
    %177 = vector.load %arg13[%c0_54, %c0_55] : memref<1x32xf32, #tpu.memory_space<vmem>>, vector<1x32xf32>
    %cst_56 = arith.constant dense<0.000000e+00> : vector<8xf32>
    %178 = vector.multi_reduction <add>, %175, %cst_56 [1] : vector<8x32xf32> to vector<8xf32>
    %179 = vector.shape_cast %178 : vector<8xf32> to vector<8x1xf32>
    %cst_57 = arith.constant 3.200000e+01 : f32
    %180 = vector.broadcast %cst_57 : f32 to vector<8x1xf32>
    %181 = arith.divf %179, %180 : vector<8x1xf32>
    %182 = vector.broadcast %181 : vector<8x1xf32> to vector<8x32xf32>
    %183 = arith.subf %175, %182 : vector<8x32xf32>
    %184 = arith.mulf %183, %183 : vector<8x32xf32>
    %cst_58 = arith.constant dense<0.000000e+00> : vector<8xf32>
    %185 = vector.multi_reduction <add>, %184, %cst_58 [1] : vector<8x32xf32> to vector<8xf32>
    %186 = vector.shape_cast %185 : vector<8xf32> to vector<8x1xf32>
    %cst_59 = arith.constant 3.200000e+01 : f32
    %187 = vector.broadcast %cst_59 : f32 to vector<8x1xf32>
    %188 = arith.divf %186, %187 : vector<8x1xf32>
    %189 = vector.broadcast %181 : vector<8x1xf32> to vector<8x32xf32>
    %190 = arith.subf %175, %189 : vector<8x32xf32>
    %cst_60 = arith.constant 9.99999974E-6 : f32
    %191 = vector.broadcast %cst_60 : f32 to vector<8x1xf32>
    %192 = arith.addf %188, %191 : vector<8x1xf32>
    %193 = math.rsqrt %192 : vector<8x1xf32>
    %194 = vector.broadcast %193 : vector<8x1xf32> to vector<8x32xf32>
    %195 = arith.mulf %190, %194 : vector<8x32xf32>
    %196 = vector.broadcast %176 : vector<1x32xf32> to vector<8x32xf32>
    %197 = arith.mulf %195, %196 : vector<8x32xf32>
    %198 = vector.broadcast %177 : vector<1x32xf32> to vector<8x32xf32>
    %199 = arith.addf %197, %198 : vector<8x32xf32>
    %200 = arith.truncf %199 : vector<8x32xf32> to vector<8x32xbf16>
    %c0_61 = arith.constant 0 : index
    %c0_62 = arith.constant 0 : index
    %201 = vector.load %arg8[%c0_61, %c0_62] : memref<32x128xbf16, #tpu.memory_space<vmem>>, vector<32x128xbf16>
    %cst_63 = arith.constant dense<0.000000e+00> : vector<8x128xf32>
    %202 = tpu.matmul %200, %201, %cst_63 {dimension_numbers = #tpu.dot_dimension_numbers<[1], [0], [0], [1], [0, 0, 1, 1], [], []>} : vector<8x32xbf16>, vector<32x128xbf16>, vector<8x128xf32> -> vector<8x128xf32>
    %c0_64 = arith.constant 0 : index
    %c0_65 = arith.constant 0 : index
    %203 = vector.load %arg9[%c0_64, %c0_65] : memref<1x128xf32, #tpu.memory_space<vmem>>, vector<1x128xf32>
    %204 = vector.broadcast %203 : vector<1x128xf32> to vector<8x128xf32>
    %205 = arith.addf %202, %204 : vector<8x128xf32>
    %cst_66 = arith.constant 0.000000e+00 : f32
    %206 = vector.broadcast %cst_66 : f32 to vector<8x128xf32>
    %207 = arith.maximumf %205, %206 : vector<8x128xf32>
    %208 = arith.truncf %207 : vector<8x128xf32> to vector<8x128xbf16>
    %c0_67 = arith.constant 0 : index
    %c0_68 = arith.constant 0 : index
    %209 = vector.load %arg10[%c0_67, %c0_68] : memref<128x32xbf16, #tpu.memory_space<vmem>>, vector<128x32xbf16>
    %cst_69 = arith.constant dense<0.000000e+00> : vector<8x32xf32>
    %210 = tpu.matmul %208, %209, %cst_69 {dimension_numbers = #tpu.dot_dimension_numbers<[1], [0], [0], [1], [0, 0, 1, 1], [], []>} : vector<8x128xbf16>, vector<128x32xbf16>, vector<8x32xf32> -> vector<8x32xf32>
    %c0_70 = arith.constant 0 : index
    %c0_71 = arith.constant 0 : index
    %211 = vector.load %arg11[%c0_70, %c0_71] : memref<1x32xf32, #tpu.memory_space<vmem>>, vector<1x32xf32>
    %212 = vector.broadcast %211 : vector<1x32xf32> to vector<8x32xf32>
    %213 = arith.addf %210, %212 : vector<8x32xf32>
    %214 = arith.addf %175, %213 : vector<8x32xf32>
    %215 = vector.shape_cast %214 : vector<8x32xf32> to vector<1x8x32xf32>
    %c0_72 = arith.constant 0 : index
    %c0_73 = arith.constant 0 : index
    %c0_74 = arith.constant 0 : index
    %216 = vector.load %arg14[%c0_72, %c0_73, %c0_74] : memref<1x8x32xf32, #tpu.memory_space<vmem>>, vector<1x8x32xf32>
    tpu.vector_store %arg14[%c0_72, %c0_73, %c0_74], %215 {strides = array<i32>} : memref<1x8x32xf32, #tpu.memory_space<vmem>>, vector<1x8x32xf32>,
    return
  }
  func.func @transform_0(%arg0: i32) -> (i32, i32, i32) {
    %c0_i32 = arith.constant 0 : i32
    %c0_i32_0 = arith.constant 0 : i32
    %c0_i32_1 = arith.constant 0 : i32
    return %arg0, %c0_i32, %c0_i32_0 : i32, i32, i32
  }
  func.func @transform_1(%arg0: i32) -> (i32, i32) {
    %c0_i32 = arith.constant 0 : i32
    %c0_i32_0 = arith.constant 0 : i32
    %c0_i32_1 = arith.constant 0 : i32
    return %c0_i32, %c0_i32_0 : i32, i32
  }
  func.func @transform_2(%arg0: i32) -> (i32, i32) {
    %c0_i32 = arith.constant 0 : i32
    %c0_i32_0 = arith.constant 0 : i32
    %c0_i32_1 = arith.constant 0 : i32
    return %c0_i32, %c0_i32_0 : i32, i32
  }
  func.func @transform_3(%arg0: i32) -> (i32, i32) {
    %c0_i32 = arith.constant 0 : i32
    %c0_i32_0 = arith.constant 0 : i32
    %c0_i32_1 = arith.constant 0 : i32
    return %c0_i32, %c0_i32_0 : i32, i32
  }
  func.func @transform_4(%arg0: i32) -> (i32, i32) {
    %c0_i32 = arith.constant 0 : i32
    %c0_i32_0 = arith.constant 0 : i32
    %c0_i32_1 = arith.constant 0 : i32
    return %c0_i32, %c0_i32_0 : i32, i32
  }
  func.func @transform_5(%arg0: i32) -> (i32, i32) {
    %c0_i32 = arith.constant 0 : i32
    %c0_i32_0 = arith.constant 0 : i32
    %c0_i32_1 = arith.constant 0 : i32
    return %c0_i32, %c0_i32_0 : i32, i32
  }
  func.func @transform_6(%arg0: i32) -> (i32, i32) {
    %c0_i32 = arith.constant 0 : i32
    %c0_i32_0 = arith.constant 0 : i32
    %c0_i32_1 = arith.constant 0 : i32
    return %c0_i32, %c0_i32_0 : i32, i32
  }
  func.func @transform_7(%arg0: i32) -> (i32, i32) {
    %c0_i32 = arith.constant 0 : i32
    %c0_i32_0 = arith.constant 0 : i32
    %c0_i32_1 = arith.constant 0 : i32
    return %c0_i32, %c0_i32_0 : i32, i32
  }
  func.func @transform_8(%arg0: i32) -> (i32, i32) {
    %c0_i32 = arith.constant 0 : i32
    %c0_i32_0 = arith.constant 0 : i32
    %c0_i32_1 = arith.constant 0 : i32
    return %c0_i32, %c0_i32_0 : i32, i32
  }
  func.func @transform_9(%arg0: i32) -> (i32, i32) {
    %c0_i32 = arith.constant 0 : i32
    %c0_i32_0 = arith.constant 0 : i32
    %c0_i32_1 = arith.constant 0 : i32
    return %c0_i32, %c0_i32_0 : i32, i32
  }
  func.func @transform_10(%arg0: i32) -> (i32, i32) {
    %c0_i32 = arith.constant 0 : i32
    %c0_i32_0 = arith.constant 0 : i32
    %c0_i32_1 = arith.constant 0 : i32
    return %c0_i32, %c0_i32_0 : i32, i32
  }
  func.func @transform_11(%arg0: i32) -> (i32, i32) {
    %c0_i32 = arith.constant 0 : i32
    %c0_i32_0 = arith.constant 0 : i32
    %c0_i32_1 = arith.constant 0 : i32
    return %c0_i32, %c0_i32_0 : i32, i32
  }
  func.func @transform_12(%arg0: i32) -> (i32, i32) {
    %c0_i32 = arith.constant 0 : i32
    %c0_i32_0 = arith.constant 0 : i32
    %c0_i32_1 = arith.constant 0 : i32
    return %c0_i32, %c0_i32_0 : i32, i32
  }
  func.func @transform_13(%arg0: i32) -> (i32, i32, i32) {
    %c0_i32 = arith.constant 0 : i32
    %c0_i32_0 = arith.constant 0 : i32
    %c0_i32_1 = arith.constant 0 : i32
    return %arg0, %c0_i32, %c0_i32_0 : i32, i32, i32
  }
}

</mosaic_0001>

<bundles_post_ra>
// kernel: tpu_custom_call.1
= control target key start
LH: loop header
LB: loop body
LE: loop exit
PB: predicated region body
PF: predicated region fallthrough
CT: control target
= control target key end

     0   :  { %s1937_s0 = inlined_call_operand.vmem [shape: f32[2,8,32], index: 0, kind: input, shape index: {}]   ;;  %s1938_s1 = inlined_call_operand.vmem [shape: f32[1,32], index: 1, kind: input, shape index: {}]   ;;  %s1939_s2 = inlined_call_operand.vmem [shape: f32[1,32], index: 2, kind: input, shape index: {}]   ;;  %s1940_s3 = inlined_call_operand.vmem [shape: bf16[32,96], index: 3, kind: input, shape index: {}]   ;;  %s1941_s4 = inlined_call_operand.vmem [shape: f32[1,96], index: 4, kind: input, shape index: {}]   ;;  %s1942_s5 = inlined_call_operand.vmem [shape: bf16[32,32], index: 5, kind: input, shape index: {}]   ;;  %s1943_s6 = inlined_call_operand.vmem [shape: f32[1,32], index: 6, kind: input, shape index: {}]   ;;  %s1944_s7 = inlined_call_operand.vmem [shape: bf16[32,128], index: 7, kind: input, shape index: {}]   ;;  %s1945_s8 = inlined_call_operand.vmem [shape: f32[1,128], index: 8, kind: input, shape index: {}]   ;;  %s1946_s9 = inlined_call_operand.vmem [shape: bf16[128,32], index: 9, kind: input, shape index: {}]   ;;  %s1947_s10 = inlined_call_operand.vmem [shape: f32[1,32], index: 10, kind: input, shape index: {}]   ;;  %s1948_s11 = inlined_call_operand.vmem [shape: f32[1,32], index: 11, kind: input, shape index: {}]   ;;  %s1949_s12 = inlined_call_operand.vmem [shape: f32[1,32], index: 12, kind: input, shape index: {}]   ;;  %s1950_s13 = inlined_call_operand.hbm [shape: f32[2,8,32], index: 13, kind: output, shape index: {}]  }
   0x1   :  { %1951 = sst [smem:[#allocation5_spill]] %s1937_s0 }
   0x2   :  { %1952 = sst [smem:[#allocation6_spill]] %s1938_s1 }
   0x3   :  { %1953 = sst [smem:[#allocation7_spill]] %s1939_s2 }
   0x4   :  { %1954 = sst [smem:[#allocation8_spill]] %s1940_s3 }
   0x5   :  { %18 = vsyncpa [#allocation3], 0 }
   0x6   :  { %20 = vsyncpa [#allocation3 + $0x1], 0  ;;  %s1655_s25 = smov 0   ;;  %s1657_s26 = smov 0  }
   0x7   :  { %s1659_s27 = smov 0   ;;  %s1661_s28 = smov 0  }
   0x8 LB: > { %s1676_s29 = sadd.s32 4294967295, %s1552_s28   ;;  %s1275_s30 = sadd.s32 4294967294, %s1552_s28   ;;  %s1552_s28 = sphi %s1661_s28, %s1964_s28   ;;  %s1548_s27 = sphi %s1659_s27, %s1963_s27   ;;  %s1544_s26 = sphi %s1657_s26, %s1962_s26   ;;  %s1540_s25 = sphi %s1655_s25, %s1961_s25  }
   0x9   : > { %s1680_s14 = sadd.s32 1, %s1552_s28   ;;  %s311_s15 = sadd.s32 1, %s1548_s27 }
   0xa   : > { %s308_s16 = ssub.s32 %s1552_s28, %s1680_s14  ;;  %p321_p0 = scmp.ne.s32.totalorder %s1548_s27, %s1544_s26 }
   0xb   : > { %p309_p1 = scmp.eq.s32.totalorder %s308_s16, 0  ;;  %p322_p2 = scmp.eq.s32.totalorder %s1676_s29, 1 }
   0xc   : > { %p327_p3 = scmp.ne.s32.totalorder %s1544_s26, %s1540_s25  ;;  %p328_p4 = scmp.eq.s32.totalorder %s1275_s30, 1 }
   0xd   : > { %s1691_s17 = scalar_select %p309_p1, %s1548_s27, %s311_s15  }
   0xe   : > { %p1693_p5 = por %p322_p2, %p321_p0  ;;  %p1697_p6 = por %p328_p4, %p327_p3 }
   0xf   : > { %p1278_p7 = scmp.ge.s32.totalorder %s1552_s28, 1  ;;  %p389_p8 = scmp.lt.s32.totalorder %s1552_s28, 3 }
  0x11   : > { %p390_p9 = pnand %p1278_p7, %p389_p8 }
  0x12   : > { %p432_p10 = scmp.lt.s32.totalorder (!%p390_p9), %s1676_s29, 1  ;;  %s1957_s0 = sld [smem:[#allocation5_spill]] (!%p390_p9) }
  0x13   : > { %393 = sbr.rel (%p390_p9) target bundleno = 2077 (0x81d), region = 72  ;;  %s1958_s3 = sld [smem:[#allocation8_spill]] (!%p390_p9) }
  0x14   : > { %s1959_s1 = sld [smem:[#allocation6_spill]] (!%p390_p9)  ;;  %s1555_s16 = smov (!%p390_p9), 124  }
  0x15   : > { %s1960_s2 = sld [smem:[#allocation7_spill]] (!%p390_p9)  ;;  %s1558_s22 = smov (!%p390_p9), 76  }
  0x16   : > { %s1559_s23 = smov (!%p390_p9), 92   ;;  %s1561_s30 = smov (!%p390_p9), 84  }
  0x17   : > { %s1562_s15 = smov (!%p390_p9), 112  }
  0x18   : > { %s433_s20 = scalar_select %p432_p10, %s1676_s29, 1  ;;  %vm440_vm0 = vcmask 261120   ;;  %v1554_v2 = vmov 32.0   ;;  %v1446_v32 = vld [vmem:[%s1941_s4] ss:$0 sm:$0xff]  ;;  %vm558_vm5 = vcmask 1043456  }
  0x19   : > { %1452 = vrcp.f32 %v1554_v2  ;;  %v1361_v14 = vld [vmem:[%s1958_s3 + $0x8] sm:$0xff]  ;;  %v1360_v15 = vld [vmem:[%s1958_s3] sm:$0xff]  ;;  %vm521_vm6 = vcmask 31744   ;;  %vm541_vm7 = vcmask 64512   ;;  %vm998_vm8 = vcmask 97280  }
  0x1a   : > { %s1280_s21 = sshll.u32 %s433_s20, 3  ;;  %508 = vmatpush.bf16.msra.mxu0 %v1361_v14  ;;  %v1444_v25 = vld [vmem:[%s1959_s1] ss:$0 sm:$0xff]  ;;  %s1556_s20 = smov 64   ;;  %vm1000_vm9 = vcmask 130048   ;;  %vm1002_vm10 = vcmask 162816  }
  0x1b   : > { %s435_s24 = scalar_lea.vmem %s1957_s0, %s1280_s21  ;;  %v1445_v28 = vld [vmem:[%s1960_s2] ss:$0 sm:$0xff]  ;;  %s1557_s21 = smov 96   ;;  %vm1004_vm11 = vcmask 195584   ;;  %vm1006_vm12 = vcmask 228352  }
  0x1c   : > { %v1708_v0 = vld [vmem:[%s435_s24] sm:$0xff]  ;;  %s1560_s24 = smov 108  }
  0x1d   : > { %v441_v1 = vsel %vm440_vm0, %v1708_v0, 0.0 }
  0x1e   : > { %442 = vadd.xlane.f32.xlu0 %v441_v1  ;;  %509 = vmatpush.bf16.msra.mxu0 %v1360_v15 }
  0x1f   : > { %v1453_v3 = vpop.eup %1452 }
  0x20   : > { %v445_v4 = vmul.f32 32.0, %v1453_v3  ;;  %vm449_vm1 = vweird.f32 %v1453_v3 }
  0x22   : > { %v446_v5 = vsub.f32 1.0, %v445_v4 }
  0x24   : > { %v447_v6 = vmul.f32 %v1453_v3, %v446_v5 }
  0x26   : > { %v448_v7 = vadd.f32 %v1453_v3, %v447_v6 }
  0x28   : > { %v1712_v8 = vsel %vm449_vm1, %v1453_v3, %v448_v7 }
  0x91   : > { %v443_v9 = vpop.xlane.xlu0 %442 }
  0x92   : > { %v451_v10 = vmul.f32 %v1712_v8, %v443_v9 }
  0x94   : > { %v452_v11 = vsub.f32 %v1708_v0, %v451_v10 }
  0x96   : > { %v453_v12 = vmul.f32 %v452_v11, %v452_v11 }
  0x98   : > { %v454_v13 = vsel %vm440_vm0, %v453_v12, 0.0 }
  0x99   : > { %455 = vadd.xlane.f32.xlu0 %v454_v13 }
 0x10c   : > { %v456_v16 = vpop.xlane.xlu0 %455 }
 0x10d   : > { %v457_v17 = vmul.f32 %v456_v16, %v1712_v8 }
 0x10f   : > { %v458_v18 = vadd.f32 1e-05, %v457_v17 }
 0x111   : > { %1454 = vrsqrt.f32 %v458_v18  ;;  %vm465_vm3 = vweird.f32 %v458_v18 }
 0x117   : > { %v1455_v19 = vpop.eup %1454 }
 0x118   : > { %v460_v20 = vmul.f32 %v1455_v19, %v458_v18  ;;  %vm466_vm2 = vweird.f32 %v1455_v19 }
 0x119   : > { %vm467_vm4 = vmor %vm465_vm3, %vm466_vm2 }
 0x11a   : > { %v461_v21 = vmul.f32 %v1455_v19, %v460_v20 }
 0x11c   : > { %v462_v22 = vmul.f32 0.5, %v461_v21 }
 0x11e   : > { %v463_v23 = vsub.f32 1.5, %v462_v22 }
 0x120   : > { %v464_v24 = vmul.f32 %v1455_v19, %v463_v23 }
 0x122   : > { %v468_v26 = vsel %vm467_vm4, %v1455_v19, %v464_v24 }
 0x123   : > { %v469_v27 = vmul.f32 %v468_v26, %v452_v11 }
 0x125   : > { %v473_v29 = vmul.f32 %v1444_v25, %v469_v27 }
 0x127   : > { %v477_v30 = vadd.f32 %v1445_v28, %v473_v29 }
 0x129   : > { %v478_v31 = vpack.c.bf16 %v477_v30, %v477_v30 }
 0x12b   : > { %1289 = vmatmul.msk.bf16.vlgmr.msra.gmra.mxu0 %vm440_vm0, %v478_v31 }
 0x1a8   : > { %v511_v33 = vpop.f32.mrf.mxu0 }
 0x1a9   : > { %v512_v34 = vadd.f32 %v1446_v32, %v511_v33 }
 0x1ab   : > { %v515_v35 = vpack.c.bf16 %v512_v34, %v512_v34 }
 0x1ad   : > { %v517_v36 = vunpack.c.l.b16 %v515_v35 }
 0x1af   : > { %v1734_v37 = vpack.c.b16 %v517_v36, %v517_v36 }
 0x1b0   : > { %v513_v38 = vpop.f32.mrf.mxu0 }
 0x1b1   : > { %576 = vrot.lane.b32.xlu0 %v1734_v37, %s1555_s16  ;;  %553 = vrot.lane.b32.xlu2 %v1734_v37, %s1556_s20  ;;  %s1563_s16 = smov 116   ;;  %s1564_s20 = smov 72  }
 0x1b2   : > { %519 = vrot.lane.b32.xlu1 %v1734_v37, %s1557_s21  ;;  %s1565_s21 = smov 88  }
 0x1b9   : > { %802 = vrot.lane.b32.xlu0 %v1734_v37, %s1558_s22  ;;  %578 = vrot.lane.b32.xlu2 %v1734_v37, %s1559_s23  ;;  %s1566_s22 = smov 52   ;;  %s1567_s23 = smov 120  }
 0x1c1   : > { %800 = vrot.lane.b32.xlu0 %v1734_v37, %s1560_s24  ;;  %690 = vrot.lane.b32.xlu2 %v1734_v37, %s1561_s30  ;;  %s1568_s24 = smov 80   ;;  %s1569_s30 = smov 100  }
 0x1c9   : > { %744 = vrot.lane.b32.xlu0 %v1734_v37, %s1562_s15  ;;  %688 = vrot.lane.b32.xlu2 %v1734_v37, %s1563_s16  ;;  %s1570_s15 = smov 104   ;;  %s1571_s16 = smov 60  }
 0x1d1   : > { %858 = vrot.lane.b32.xlu0 %v1734_v37, %s1564_s20  ;;  %634 = vrot.lane.b32.xlu2 %v1734_v37, %s1565_s21  ;;  %s1572_s20 = smov 68   ;;  %s1573_s21 = smov 48  }
 0x1d9   : > { %722 = vrot.lane.b32.xlu0 %v1734_v37, %s1566_s22  ;;  %632 = vrot.lane.b32.xlu2 %v1734_v37, %s1567_s23  ;;  %s1574_s22 = smov 36   ;;  %s1575_s23 = smov 40  }
 0x1e1   : > { %746 = vrot.lane.b32.xlu2 %v1734_v37, %s1568_s24  ;;  %s1576_s24 = smov 56  }
 0x1e9   : > { %912 = vrot.lane.b32.xlu2 %v1734_v37, %s1569_s30  ;;  %s1577_s30 = smov 44  }
 0x1f1   : > { %856 = vrot.lane.b32.xlu2 %v1734_v37, %s1570_s15  ;;  %s1578_s15 = smov 8  }
 0x1f9   : > { %610 = vrot.lane.b32.xlu2 %v1734_v37, %s1571_s16  ;;  %s1579_s16 = smov 16  }
 0x20b   : > { %v554_v39 = vpop.permute.xlu2 %553 }
 0x20c   : > { %v560_v40 = vsel %vm558_vm5, %v554_v39, 0 }
 0x20d   : > { %569 = vmatpush.bf16.msra.mxu2 %v560_v40 }
 0x213   : > { %v579_v41 = vpop.permute.xlu2 %578 }
 0x214   : > { %v584_v42 = vsel %vm521_vm6, %v579_v41, 0 }
 0x215   : > { %593 = vmatpush.bf16.xpose.msrb.mxu2 %v584_v42 }
 0x21b   : > { %v691_v43 = vpop.permute.xlu2 %690 }
 0x21c   : > { %v696_v44 = vsel %vm521_vm6, %v691_v43, 0 }
 0x21d   : > { %705 = vmatpush.bf16.xpose.msra.mxu3 %v696_v44 }
 0x223   : > { %v1756_v45 = vpop.permute.xlu0 %576  ;;  %v689_v46 = vpop.permute.xlu2 %688 }
 0x224   : > { %v520_v47 = vpop.permute.xlu1 %519  ;;  %1296 = vmatmul.msk.bf16.vlgmr.msra.gmra.mxu3 %vm521_vm6, %v689_v46 }
 0x225   : > { %v526_v48 = vsel %vm521_vm6, %v520_v47, 0 }
 0x226   : > { %535 = vmatpush.bf16.xpose.msra.mxu1 %v526_v48 }
 0x22b   : > { %v803_v49 = vpop.permute.xlu0 %802  ;;  %v635_v50 = vpop.permute.xlu2 %634 }
 0x22c   : > { %v640_v51 = vsel %vm521_vm6, %v635_v50, 0  ;;  %v808_v52 = vsel %vm521_vm6, %v803_v49, 0 }
 0x22d   : > { %1290 = vmatmul.msk.bf16.vlgmr.msra.gmra.mxu1 %vm521_vm6, %v515_v35  ;;  %649 = vmatpush.bf16.xpose.msrb.mxu0 %v640_v51 }
 0x22e   : > { %817 = vmatpush.bf16.xpose.msrb.mxu3 %v808_v52 }
 0x233   : > { %v801_v53 = vpop.permute.xlu0 %800  ;;  %v633_v54 = vpop.permute.xlu2 %632 }
 0x234   : > { %1294 = vmatmul.msk.bf16.vlgmr.msrb.gmra.mxu0 %vm521_vm6, %v633_v54 }
 0x235   : > { %1300 = vmatmul.msk.bf16.vlgmr.msrb.gmra.mxu3 %vm521_vm6, %v801_v53 }
 0x23b   : > { %v745_v55 = vpop.permute.xlu0 %744  ;;  %v747_v56 = vpop.permute.xlu2 %746 }
 0x23c   : > { %v752_v57 = vsel %vm521_vm6, %v747_v56, 0 }
 0x23d   : > { %761 = vmatpush.bf16.xpose.msra.mxu0 %v752_v57 }
 0x243   : > { %v859_v58 = vpop.permute.xlu0 %858  ;;  %v913_v60 = vpop.permute.xlu2 %912 }
 0x244   : > { %v864_v59 = vsel %vm521_vm6, %v859_v58, 0  ;;  %1298 = vmatmul.msk.bf16.vlgmr.msra.gmra.mxu0 %vm521_vm6, %v745_v55 }
 0x245   : > { %873 = vmatpush.bf16.xpose.msrb.mxu0 %v864_v59 }
 0x24b   : > { %v857_v61 = vpop.permute.xlu2 %856  ;;  %v723_v27 = vpop.permute.xlu0 %722 }
 0x24c   : > { %v728_v28 = vsel %vm558_vm5, %v723_v27, 0 }
 0x253   : > { %v611_v21 = vpop.permute.xlu2 %610 }
 0x254   : > { %1302 = vmatmul.msk.bf16.vlgmr.msrb.gmra.mxu0 %vm521_vm6, %v857_v61  ;;  %v616_v23 = vsel %vm558_vm5, %v611_v21, 0 }
 0x2a7   : > { %v707_v62 = vpop.f32.mrf.mxu3 }
 0x2a8   : > { %v711_v16 = vsel %vm541_vm7, %v707_v62, -inf }
 0x2aa   : > { %v537_v63 = vpop.f32.mrf.mxu1 }
 0x2ab   : > { %v542_v1 = vsel %vm541_vm7, %v537_v63, -inf }
 0x2ac   : > { %543 = vmax.xlane.f32.xlu1 %v542_v1 }
 0x2af   : > { %v709_v2 = vpop.f32.mrf.mxu3 }
 0x2b1   : > { %v651_v3 = vpop.f32.mrf.mxu0 }
 0x2b2   : > { %v539_v4 = vpop.f32.mrf.mxu1  ;;  %v655_v5 = vsel %vm541_vm7, %v651_v3, -inf }
 0x2b3   : > { %656 = vmax.xlane.f32.xlu2 %v655_v5 }
 0x2b8   : > { %v819_v6 = vpop.f32.mrf.mxu3 }
 0x2b9   : > { %v653_v7 = vpop.f32.mrf.mxu0  ;;  %v823_v13 = vsel %vm541_vm7, %v819_v6, -inf }
 0x2c0   : > { %v821_v9 = vpop.f32.mrf.mxu3 }
 0x2c1   : > { %v1771_v10 = vpop.f32.mrf.mxu0 }
 0x2c2   : > { %v767_v11 = vsel %vm541_vm7, %v1771_v10, -inf }
 0x2c3   : > { %768 = vmax.xlane.f32.xlu2 %v767_v11 }
 0x2c5   : > { %914 = vrot.lane.b32.xlu1 %v1734_v37, %s1572_s20  ;;  %s1580_s20 = smov 24  }
 0x2c9   : > { %v765_v12 = vpop.f32.mrf.mxu0 }
 0x2cb   : > { %824 = vmax.xlane.f32.xlu2 %v823_v13 }
 0x2d1   : > { %v1777_v14 = vpop.f32.mrf.mxu0 }
 0x2d2   : > { %v879_v24 = vsel %vm541_vm7, %v1777_v14, -inf }
 0x2d9   : > { %v877_v15 = vpop.f32.mrf.mxu0 }
 0x2e3   : > { %778 = vrot.lane.b32.xlu2 %v1734_v37, %s1573_s21  ;;  %s1581_s21 = smov 4  }
 0x2eb   : > { %946 = vrot.lane.b32.xlu2 %v1734_v37, %s1574_s22  ;;  %s1582_s22 = smov 12  }
 0x2ef   : > { %712 = vmax.xlane.f32.xlu1 %v711_v16 }
 0x2f3   : > { %890 = vrot.lane.b32.xlu2 %v1734_v37, %s1575_s23  ;;  %s1583_s23 = smov 20  }
 0x308   : > { %666 = vrot.lane.b32.xlu1 %v1734_v37, %s1576_s24  ;;  %s1584_s24 = smov 28  }
 0x31f   : > { %v544_v17 = vpop.xlane.xlu1 %543 }
 0x320   : > { %v545_v18 = vsub.f32 %v537_v63, %v544_v17 }
 0x322   : > { %v546_v19 = vmul.f32 1.442695, %v545_v18 }
 0x324   : > { %1456 = vpow2.f32 %v546_v19 }
 0x326   : > { %v657_v29 = vpop.xlane.xlu2 %656 }
 0x327   : > { %v658_v39 = vsub.f32 %v651_v3, %v657_v29 }
 0x329   : > { %v659_v42 = vmul.f32 1.442695, %v658_v39 }
 0x32a   : > { %v1784_v20 = vpop.eup %1456 }
 0x32b   : > { %v552_v22 = vpack.c.bf16 %v1784_v20, %v1784_v20  ;;  %v548_v15 = vsel %vm541_vm7, %v1784_v20, 0.0 }
 0x32d   : > { %1291 = vmatmul.msk.bf16.vlgmr.msra.gmra.mxu2 %vm541_vm7, %v552_v22 }
 0x32e   : > { %625 = vmatpush.bf16.msra.mxu2 %v616_v23 }
 0x332   : > { %880 = vmax.xlane.f32.xlu1 %v879_v24 }
 0x336   : > { %v769_v30 = vpop.xlane.xlu2 %768 }
 0x337   : > { %v915_v25 = vpop.permute.xlu1 %914  ;;  %v770_v49 = vsub.f32 %v1771_v10, %v769_v30 }
 0x338   : > { %v920_v26 = vsel %vm521_vm6, %v915_v25, 0 }
 0x339   : > { %929 = vmatpush.bf16.xpose.msra.mxu3 %v920_v26  ;;  %v771_v54 = vmul.f32 1.442695, %v770_v49 }
 0x33d   : > { %1292 = vmatmul.msk.bf16.vlgmr.msrb.gmra.mxu2 %vm521_vm6, %v1756_v45 }
 0x33e   : > { %737 = vmatpush.bf16.msrb.mxu2 %v728_v28  ;;  %v825_v31 = vpop.xlane.xlu2 %824 }
 0x33f   : > { %v826_v34 = vsub.f32 %v819_v6, %v825_v31 }
 0x340   : > { %1304 = vmatmul.msk.bf16.vlgmr.msra.gmra.mxu3 %vm521_vm6, %v913_v60 }
 0x341   : > { %v827_v38 = vmul.f32 1.442695, %v826_v34 }
 0x346   : > { %v779_v36 = vpop.permute.xlu2 %778 }
 0x347   : > { %v784_v50 = vsel %vm558_vm5, %v779_v36, 0 }
 0x34e   : > { %v1801_v43 = vpop.permute.xlu2 %946 }
 0x34f   : > { %v952_v26 = vsel %vm558_vm5, %v1801_v43, 0 }
 0x356   : > { %v891_v51 = vpop.permute.xlu2 %890 }
 0x357   : > { %v896_v53 = vsel %vm558_vm5, %v891_v51, 0 }
 0x362   : > { %v713_v32 = vpop.xlane.xlu1 %712 }
 0x363   : > { %v714_v33 = vsub.f32 %v707_v62, %v713_v32 }
 0x365   : > { %v715_v35 = vmul.f32 1.442695, %v714_v33 }
 0x367   : > { %1458 = vpow2.f32 %v715_v35 }
 0x368   : > { %1460 = vpow2.f32 %v827_v38 }
 0x369   : > { %1462 = vpow2.f32 %v659_v42 }
 0x36a   : > { %1464 = vpow2.f32 %v771_v54 }
 0x36d   : > { %v1797_v40 = vpop.eup %1458 }
 0x36e   : > { %v717_v41 = vsel %vm541_vm7, %v1797_v40, 0.0  ;;  %v1803_v44 = vpop.eup %1460  ;;  %v721_v20 = vpack.c.bf16 %v1797_v40, %v1797_v40 }
 0x36f   : > { %718 = vadd.xlane.f32.xlu1 %v717_v41  ;;  %v829_v45 = vsel %vm541_vm7, %v1803_v44, 0.0  ;;  %v1463_v46 = vpop.eup %1462  ;;  %v833_v27 = vpack.c.bf16 %v1803_v44, %v1803_v44 }
 0x370   : > { %v665_v52 = vpack.c.bf16 %v1463_v46, %v1463_v46  ;;  %v1465_v55 = vpop.eup %1464  ;;  %v661_v10 = vsel %vm541_vm7, %v1463_v46, 0.0 }
 0x371   : > { %v777_v56 = vpack.c.bf16 %v1465_v55, %v1465_v55  ;;  %v773_v12 = vsel %vm541_vm7, %v1465_v55, 0.0 }
 0x377   : > { %830 = vadd.xlane.f32.xlu1 %v829_v45 }
 0x37a   : > { %v667_v47 = vpop.permute.xlu1 %666 }
 0x37b   : > { %v672_v48 = vsel %vm558_vm5, %v667_v47, 0 }
 0x37c   : > { %681 = vmatpush.bf16.msrb.mxu1 %v672_v48 }
 0x37f   : > { %1295 = vmatmul.msk.bf16.vlgmr.msrb.gmra.mxu1 %vm541_vm7, %v665_v52 }
 0x380   : > { %793 = vmatpush.bf16.msra.mxu1 %v784_v50 }
 0x384   : > { %905 = vmatpush.bf16.msrb.mxu1 %v896_v53 }
 0x38f   : > { %1299 = vmatmul.msk.bf16.vlgmr.msra.gmra.mxu1 %vm541_vm7, %v777_v56 }
 0x3a5   : > { %v881_v57 = vpop.xlane.xlu1 %880 }
 0x3a6   : > { %v882_v58 = vsub.f32 %v1777_v14, %v881_v57 }
 0x3a8   : > { %v883_v59 = vmul.f32 1.442695, %v882_v58 }
 0x3aa   : > { %1466 = vpow2.f32 %v883_v59 }
 0x3b0   : > { %v1467_v60 = vpop.eup %1466  ;;  %v1814_v61 = vpop.f32.mrf.mxu2 }
 0x3b1   : > { %v889_v62 = vpack.c.bf16 %v1467_v60, %v1467_v60  ;;  %v885_v14 = vsel %vm541_vm7, %v1467_v60, 0.0 }
 0x3b3   : > { %1303 = vmatmul.msk.bf16.vlgmr.msrb.gmra.mxu1 %vm541_vm7, %v889_v62 }
 0x3b8   : > { %v573_v63 = vpop.f32.mrf.mxu2 }
 0x3c0   : > { %v595_v1 = vpop.f32.mrf.mxu2 }
 0x3c1   : > { %v599_v2 = vsel %vm541_vm7, %v595_v1, -inf }
 0x3c2   : > { %600 = vmax.xlane.f32.xlu0 %v599_v2  ;;  %v1363_v2 = vld [vmem:[%s1942_s5 + $0x8] sm:$0xff] }
 0x3c3   : > { %v931_v3 = vpop.f32.mrf.mxu3  ;;  %1038 = vmatpush.bf16.msra.mxu0 %v1363_v2 }
 0x3c4   : > { %v935_v7 = vsel %vm541_vm7, %v931_v3, -inf }
 0x3c8   : > { %v597_v4 = vpop.f32.mrf.mxu2 }
 0x3cb   : > { %v933_v5 = vpop.f32.mrf.mxu3 }
 0x3d6   : > { %834 = vrot.lane.b32.xlu0 %v1734_v37, %s1577_s30  ;;  %s429_s30 = sand.u32 1, %s1544_s26  }
 0x3e2   : > { %v719_v48 = vpop.xlane.xlu1 %718 }
 0x3ea   : > { %v831_v53 = vpop.xlane.xlu1 %830 }
 0x3fc   : > { %v683_v6 = vpop.f32.mrf.mxu1 }
 0x400   : > { %936 = vmax.xlane.f32.xlu0 %v935_v7 }
 0x404   : > { %v685_v9 = vpop.f32.mrf.mxu1 }
 0x408   : > { %662 = vadd.xlane.f32.xlu0 %v661_v10 }
 0x40c   : > { %v795_v11 = vpop.f32.mrf.mxu1 }
 0x410   : > { %774 = vadd.xlane.f32.xlu0 %v773_v12 }
 0x414   : > { %v797_v13 = vpop.f32.mrf.mxu1 }
 0x418   : > { %886 = vadd.xlane.f32.xlu0 %v885_v14 }
 0x420   : > { %549 = vadd.xlane.f32.xlu0 %v548_v15 }
 0x430   : > { %v907_v37 = vpop.f32.mrf.mxu1 }
 0x435   : > { %v601_v16 = vpop.xlane.xlu0 %600 }
 0x436   : > { %v602_v17 = vsub.f32 %v595_v1, %v601_v16 }
 0x438   : > { %v603_v18 = vmul.f32 1.442695, %v602_v17  ;;  %v909_v19 = vpop.f32.mrf.mxu1 }
 0x43a   : > { %1468 = vpow2.f32 %v603_v18 }
 0x440   : > { %v1469_v21 = vpop.eup %1468 }
 0x441   : > { %v609_v22 = vpack.c.bf16 %v1469_v21, %v1469_v21  ;;  %v605_v23 = vsel %vm541_vm7, %v1469_v21, 0.0 }
 0x442   : > { %606 = vadd.xlane.f32.xlu2 %v605_v23 }
 0x443   : > { %1293 = vmatmul.msk.bf16.vlgmr.msra.gmra.mxu2 %vm541_vm7, %v609_v22  ;;  %v1447_v22 = vld [vmem:[%s1943_s6] ss:$0 sm:$0xff] }
 0x448   : > { %v835_v24 = vpop.permute.xlu0 %834 }
 0x449   : > { %v840_v25 = vsel %vm558_vm5, %v835_v24, 0 }
 0x44a   : > { %849 = vmatpush.bf16.msra.mxu2 %v840_v25 }
 0x453   : > { %1297 = vmatmul.msk.bf16.vlgmr.msrb.gmra.mxu2 %vm541_vm7, %v721_v20 }
 0x454   : > { %961 = vmatpush.bf16.msrb.mxu2 %v952_v26 }
 0x463   : > { %1301 = vmatmul.msk.bf16.vlgmr.msra.gmra.mxu2 %vm541_vm7, %v833_v27 }
 0x473   : > { %v937_v28 = vpop.xlane.xlu0 %936 }
 0x474   : > { %v938_v29 = vsub.f32 %v931_v3, %v937_v28  ;;  %v1362_v3 = vld [vmem:[%s1942_s5] sm:$0xff] }
 0x475   : > { %1039 = vmatpush.bf16.msra.mxu0 %v1362_v3 }
 0x476   : > { %v939_v30 = vmul.f32 1.442695, %v938_v29 }
 0x478   : > { %1470 = vpow2.f32 %v939_v30 }
 0x47b   : > { %v663_v31 = vpop.xlane.xlu0 %662 }
 0x47c   : > { %1472 = vrcp.f32 %v663_v31 }
 0x47e   : > { %v1471_v32 = vpop.eup %1470 }
 0x47f   : > { %v945_v33 = vpack.c.bf16 %v1471_v32, %v1471_v32  ;;  %v941_v34 = vsel %vm541_vm7, %v1471_v32, 0.0  ;;  %v1365_v32 = vld [vmem:[%s1944_s7 + $0x8] sm:$0xff] }
 0x480   : > { %942 = vadd.xlane.f32.xlu1 %v941_v34  ;;  %1108 = vmatpush.bf16.msra.mxu1 %v1365_v32 }
 0x481   : > { %1305 = vmatmul.msk.bf16.vlgmr.msrb.gmra.mxu2 %vm541_vm7, %v945_v33  ;;  %v1373_v33 = vld [vmem:[%s1946_s9 + $0x38] sm:$0xff] }
 0x482   : > { %v1473_v35 = vpop.eup %1472  ;;  %1185 = vmatpush.bf16.msrb.mxu3 %v1373_v33 }
 0x483   : > { %v775_v36 = vpop.xlane.xlu0 %774  ;;  %v687_v38 = vmul.f32 %v1473_v35, %v683_v6 }
 0x484   : > { %1474 = vrcp.f32 %v775_v36  ;;  %v1372_v36 = vld [vmem:[%s1946_s9 + $0x30] sm:$0xff] }
 0x485   : > { %973 = vrot.lane.b32.xlu0 %v687_v38, %s1578_s15  ;;  %s1279_s15 = sshll.u32 %s429_s30, 3 }
 0x486   : > { %1186 = vmatpush.bf16.msrb.mxu3 %v1372_v36 }
 0x48a   : > { %v1475_v39 = vpop.eup %1474 }
 0x48b   : > { %v887_v40 = vpop.xlane.xlu0 %886  ;;  %v799_v41 = vmul.f32 %v1475_v39, %v795_v11  ;;  %v1371_v39 = vld [vmem:[%s1946_s9 + $0x28] sm:$0xff] }
 0x48c   : > { %1476 = vrcp.f32 %v887_v40  ;;  %1187 = vmatpush.bf16.msrb.mxu3 %v1371_v39  ;;  %v1370_v40 = vld [vmem:[%s1946_s9 + $0x20] sm:$0xff] }
 0x48d   : > { %981 = vrot.lane.b32.xlu0 %v799_v41, %s1579_s16  ;;  %s1357_s16 = sshll.u32 %s1676_s29, 3  ;;  %s1201_s29 = scalar_lea.sflag [#allocation3], %s429_s30 }
 0x48e   : > { %s1211_s1 = scalar_lea.hbm %s1950_s13, %s1357_s16 }
 0x48f   : > { %s1215_s2 = sshll.u32 %s1211_s1, 4  ;;  %s1216_s2 = int_to_ptr.hbm [resolvable:$true] %s1215_s2 }
 0x490   : > { %1188 = vmatpush.bf16.msrb.mxu3 %v1370_v40  ;;  %s1504_s3 = sshra.s32 %s1216_s2, 4  ;;  %s1505_s3 = int_to_ptr.hbm [resolvable:$true] %s1504_s3 }
 0x491   : > { %s1506_s0 = scalar_lea.hbm %s1505_s3, 8  ;;  %p1511_p0 = scmp.lt.s32.totalorder %s1505_s3, %s1950_s13 }
 0x492   : > { %v1477_v42 = vpop.eup %1476  ;;  %p1507_p11 = scmp.ne.s32.totalorder %s1505_s3, %s1506_s0 }
 0x493   : > { %v911_v43 = vmul.f32 %v1477_v42, %v907_v37  ;;  %v550_v4 = vpop.xlane.xlu0 %549 }
 0x494   : > { %p1508_p12 = pnand %p1507_p11, %p1693_p5 }
 0x495   : > { %989 = vrot.lane.b32.xlu0 %v911_v43, %s1580_s20 }
 0x496   : > { %p1509_p13 = pneg %p1508_p12 }
 0x4b5   : > { %v607_v44 = vpop.xlane.xlu2 %606 }
 0x4b6   : > { %1478 = vrcp.f32 %v607_v44 }
 0x4b7   : > { %1480 = vrcp.f32 %v719_v48  ;;  %v1448_v48 = vld [vmem:[%s1948_s11] ss:$0 sm:$0xff] }
 0x4b8   : > { %1482 = vrcp.f32 %v831_v53 }
 0x4bc   : > { %v1479_v45 = vpop.eup %1478 }
 0x4bd   : > { %v1481_v50 = vpop.eup %1480 }
 0x4be   : > { %v1483_v55 = vpop.eup %1482 }
 0x4c6   : > { %v627_v46 = vpop.f32.mrf.mxu2 }
 0x4c7   : > { %v631_v47 = vmul.f32 %v1479_v45, %v627_v46  ;;  %v1368_v45 = vld [vmem:[%s1946_s9 + $0x10] sm:$0xff] }
 0x4c9   : > { %969 = vrot.lane.b32.xlu1 %v631_v47, %s1581_s21 }
 0x4ce   : > { %v629_v49 = vpop.f32.mrf.mxu2 }
 0x4d6   : > { %v739_v51 = vpop.f32.mrf.mxu2 }
 0x4d7   : > { %v743_v52 = vmul.f32 %v1481_v50, %v739_v51  ;;  %v1449_v51 = vld [vmem:[%s1949_s12] ss:$0 sm:$0xff] }
 0x4d9   : > { %977 = vrot.lane.b32.xlu2 %v743_v52, %s1582_s22 }
 0x4de   : > { %v741_v54 = vpop.f32.mrf.mxu2 }
 0x4e6   : > { %v851_v56 = vpop.f32.mrf.mxu2 }
 0x4e7   : > { %v855_v57 = vmul.f32 %v1483_v55, %v851_v56  ;;  %v1367_v55 = vld [vmem:[%s1946_s9 + $0x8] sm:$0xff]  ;;  %v1366_v56 = vld [vmem:[%s1946_s9] sm:$0xff] }
 0x4e9   : > { %985 = vrot.lane.b32.xlu1 %v855_v57, %s1583_s23  ;;  %v1450_v57 = vld [vmem:[%s1945_s8] ss:$0 sm:$0xff]  ;;  %s431_s23 = scalar_lea.vmem [#allocation2], %s1279_s15  ;;  %s1510_s15 = scalar_lea.hbm %s1950_s13, 16 }
 0x4ea   : > { %p1512_p1 = scmp.lt.s32.totalorder %s1510_s15, %s1506_s0 }
 0x4ec   : > { %p1513_p2 = por %p1512_p1, %p1511_p0 }
 0x4ee   : > { %v853_v58 = vpop.f32.mrf.mxu2  ;;  %p1514_p3 = pnand %p1513_p2, %p1509_p13 }
 0x4f3   : > { %v943_v59 = vpop.xlane.xlu1 %942 }
 0x4f4   : > { %1484 = vrcp.f32 %v943_v59 }
 0x4f5   : > { %1486 = vrcp.f32 %v550_v4 }
 0x4f7   : > { %v974_v5 = vpop.permute.xlu0 %973 }
 0x4fa   : > { %v1485_v60 = vpop.eup %1484 }
 0x4fb   : > { %v1487_v6 = vpop.eup %1486 }
 0x4fc   : > { %v575_v9 = vmul.f32 %v1487_v6, %v1814_v61 }
 0x4ff   : > { %v982_v11 = vpop.permute.xlu0 %981 }
 0x504   : > { %v963_v62 = vpop.f32.mrf.mxu2 }
 0x505   : > { %v967_v63 = vmul.f32 %v1485_v60, %v963_v62 }
 0x507   : > { %993 = vrot.lane.b32.xlu1 %v967_v63, %s1584_s24  ;;  %v990_v17 = vpop.permute.xlu0 %989  ;;  %s1213_s24 = sshll.u32 %s431_s23, 4  ;;  %s1214_s24 = int_to_ptr.vmem [resolvable:$true] %s1213_s24 }
 0x50c   : > { %v965_v1 = vpop.f32.mrf.mxu2 }
 0x50d   : > { %v1451_v1 = vld [vmem:[%s1947_s10] ss:$0 sm:$0xff] }
 0x533   : > { %v978_v13 = vpop.permute.xlu2 %977 }
 0x53b   : > { %v970_v7 = vpop.permute.xlu1 %969 }
 0x53c   : > { %v996_v10 = vsel %vm521_vm6, %v575_v9, %v970_v7 }
 0x53d   : > { %v997_v12 = vsel %vm541_vm7, %v996_v10, %v974_v5 }
 0x53e   : > { %v999_v15 = vsel %vm998_vm8, %v997_v12, %v978_v13 }
 0x53f   : > { %v1001_v37 = vsel %vm1000_vm9, %v999_v15, %v982_v11 }
 0x55b   : > { %v986_v14 = vpop.permute.xlu1 %985 }
 0x55c   : > { %v1003_v16 = vsel %vm1002_vm10, %v1001_v37, %v986_v14 }
 0x55d   : > { %v1005_v19 = vsel %vm1004_vm11, %v1003_v16, %v990_v17 }
 0x579   : > { %v994_v18 = vpop.permute.xlu1 %993 }
 0x57a   : > { %v1007_v21 = vsel %vm1006_vm12, %v1005_v19, %v994_v18 }
 0x57b   : > { %v1008_v61 = vpack.c.bf16 %v1007_v21, %v1007_v21 }
 0x57d   : > { %1314 = vmatmul.msk.bf16.vlgmr.msra.gmra.mxu0 %vm440_vm0, %v1008_v61 }
 0x5fa   : > { %v1041_v23 = vpop.f32.mrf.mxu0 }
 0x5fb   : > { %v1042_v24 = vadd.f32 %v1447_v22, %v1041_v23 }
 0x5fd   : > { %v1852_v25 = vadd.f32 %v1042_v24, %v1708_v0  ;;  %v1364_v0 = vld [vmem:[%s1944_s7] sm:$0xff] }
 0x5fe   : > { %1109 = vmatpush.bf16.msra.mxu1 %v1364_v0 }
 0x5ff   : > { %v1048_v20 = vsel %vm440_vm0, %v1852_v25, 0.0 }
 0x600   : > { %1049 = vadd.xlane.f32.xlu2 %v1048_v20 }
 0x602   : > { %v1043_v26 = vpop.f32.mrf.mxu0 }
 0x673   : > { %v1050_v27 = vpop.xlane.xlu2 %1049 }
 0x674   : > { %v1051_v28 = vmul.f32 %v1050_v27, %v1712_v8 }
 0x676   : > { %v1052_v29 = vsub.f32 %v1852_v25, %v1051_v28 }
 0x678   : > { %v1053_v30 = vmul.f32 %v1052_v29, %v1052_v29 }
 0x67a   : > { %v1054_v31 = vsel %vm440_vm0, %v1053_v30, 0.0 }
 0x67b   : > { %1055 = vadd.xlane.f32.xlu0 %v1054_v31 }
 0x6ee   : > { %v1056_v34 = vpop.xlane.xlu0 %1055 }
 0x6ef   : > { %v1057_v35 = vmul.f32 %v1056_v34, %v1712_v8  ;;  %v1369_v8 = vld [vmem:[%s1946_s9 + $0x18] sm:$0xff] }
 0x6f0   : > { %1189 = vmatpush.bf16.msrb.mxu3 %v1369_v8 }
 0x6f1   : > { %v1058_v38 = vadd.f32 1e-05, %v1057_v35 }
 0x6f3   : > { %1488 = vrsqrt.f32 %v1058_v38  ;;  %vm1065_vm14 = vweird.f32 %v1058_v38 }
 0x6f4   : > { %1190 = vmatpush.bf16.msrb.mxu3 %v1368_v45 }
 0x6f8   : > { %1191 = vmatpush.bf16.msrb.mxu3 %v1367_v55 }
 0x6f9   : > { %v1489_v41 = vpop.eup %1488 }
 0x6fa   : > { %v1060_v42 = vmul.f32 %v1489_v41, %v1058_v38  ;;  %vm1066_vm13 = vweird.f32 %v1489_v41 }
 0x6fb   : > { %vm1067_vm15 = vmor %vm1065_vm14, %vm1066_vm13 }
 0x6fc   : > { %v1061_v43 = vmul.f32 %v1489_v41, %v1060_v42  ;;  %1192 = vmatpush.bf16.msrb.mxu3 %v1366_v56 }
 0x6fe   : > { %v1062_v44 = vmul.f32 0.5, %v1061_v43 }
 0x700   : > { %v1063_v46 = vsub.f32 1.5, %v1062_v44 }
 0x702   : > { %v1064_v47 = vmul.f32 %v1489_v41, %v1063_v46 }
 0x704   : > { %v1068_v49 = vsel %vm1067_vm15, %v1489_v41, %v1064_v47 }
 0x705   : > { %v1069_v50 = vmul.f32 %v1068_v49, %v1052_v29 }
 0x707   : > { %v1073_v52 = vmul.f32 %v1448_v48, %v1069_v50 }
 0x709   : > { %v1077_v53 = vadd.f32 %v1449_v51, %v1073_v52 }
 0x70b   : > { %v1078_v54 = vpack.c.bf16 %v1077_v53, %v1077_v53 }
 0x70d   : > { %1323 = vmatmul.msk.bf16.vlgmr.msra.gmra.mxu1 %vm440_vm0, %v1078_v54 }
 0x78a   : > { %v1111_v58 = vpop.f32.mrf.mxu1 }
 0x78b   : > { %v1112_v59 = vadd.f32 %v1450_v57, %v1111_v58 }
 0x78d   : > { %v1115_v60 = vmax.f32 %v1112_v59, 0.0 }
 0x78f   : > { %v1116_v62 = vpack.c.bf16 %v1115_v60, %v1115_v60 }
 0x791   : > { %1193 = vmatmul.bf16.vlgmr.msrb.gmra.mxu3 %v1116_v62 }
 0x792   : > { %v1113_v63 = vpop.f32.mrf.mxu1 }
 0x814   : > { %v1194_v2 = vpop.f32.mrf.mxu3 }
 0x815   : > { %v1195_v3 = vadd.f32 %v1451_v1, %v1194_v2 }
 0x817   : > { %v1198_v4 = vadd.f32 %v1195_v3, %v1852_v25 }
 0x819   : > { %1199 = vst.msk [vmem:[%s431_s23] sm:$0xff] %vm440_vm0, %v1198_v4 }
 0x81a   : > { %1517 = shalt.err (!%p1514_p3)
}
 0x81b   : > { %1374 = dma.vmem_to_hbm [thread:$0]  (%p1693_p5), %s1214_s24, 128, %s1216_s2, %s1201_s29  }
 0x81c   : > { %v1196_v5 = vpop.f32.mrf.mxu3 }
 0x81d PF: > { %p1380_p4 = scmp.ge.s32.totalorder %s1552_s28, 2  ;;  %s1227_s30 = sand.u32 1, %s1540_s25  }
 0x81e   : > { %s1228_s22 = scalar_lea.sflag [#allocation3], %s1227_s30 }
 0x81f   : > { %p1377_p7 = pnand %p1380_p4, %p1697_p6 }
 0x821   : > { %p1378_p8 = pneg %p1377_p7 }
 0x823   : > { %1535 = dma.done.wait (%p1378_p8), %s1228_s22, 128  }
 0x824   : > { %1537 = vsyncadd (%p1378_p8), %s1228_s22, 4294967168  ;;  %p23_p9 = scmp.ge.s32.totalorder %s1680_s14, 4   ;;  %s1961_s25 = smov %s1544_s26 }
 0x825   : > { %s1962_s26 = smov %s1548_s27  ;;  %s1963_s27 = smov %s1691_s17 }
 0x826   : > { %s1964_s28 = smov %s1680_s14  ;;  %25 = sbr.rel (!%p23_p9) target bundleno = 8 (0x8), region = 107 }
 0x82b   :  { %1234 = vsyncpa [#allocation3], 1 }
 0x82c   :  { %1236 = vsyncpa [#allocation3 + $0x1], 1 }

</bundles_post_ra>
